<compile_context>
chip_gen: v5e
topology: v5e:2x2
jax: 0.10.0
libtpu: 0.0.40
codegen_flags: <defaults>
</compile_context>

<pallas_src>
import jax
import jax.numpy as jnp
from jax.experimental import pallas as pl
from jax.experimental.pallas import tpu as pltpu

HIDDEN = 32
VOCAB = 128
N_RATING = 5
N_POS = 18
N_DIS = 5
LN_EPS = 1e-12
LANE = 128
NEG_BIG = -1e30
MAX_TILE = 2048


# ---------------------------------------------------------------------------
# in-kernel helpers
# ---------------------------------------------------------------------------
def _gelu(x):
    # config.hidden_act = "gelu_new" (tanh approximation)
    return jax.nn.gelu(x, approximate=True)


def _log1p_stable(t):
    """log(1 + t) for t in (0, 1], precision-safe for tiny t (basic ops only)."""
    return jnp.where(t > 1e-4, jnp.log(1.0 + t), t * (1.0 - 0.5 * t))


def _ce_rows(logits, labels):
    """Per-row cross entropy, PyTorch semantics (ignore_index=-100).

    logits: (T, C) f32 (padded classes carry -1e30 bias -> exp underflows to 0),
    labels: (T, 1) int32.  Returns (loss_rows (T,1), valid_rows (T,1) f32)."""
    m = jnp.max(logits, axis=-1, keepdims=True)
    lse = m + jnp.log(jnp.sum(jnp.exp(logits - m), axis=-1, keepdims=True))
    onehot = jax.lax.broadcasted_iota(jnp.int32, logits.shape, 1) == labels
    picked = jnp.sum(jnp.where(onehot, logits, 0.0), axis=-1, keepdims=True)
    valid = labels != -100
    loss = jnp.where(valid, lse - picked, 0.0)
    return loss, valid.astype(jnp.float32)


def _grouped_layernorm(h, mavg, gamma, beta):
    """LayerNorm within groups of HIDDEN lanes; statistics via MXU matmul
    against the block-averaging matrix `mavg` (no cross-lane XLU reductions)."""
    mu = jnp.dot(h, mavg, preferred_element_type=jnp.float32)
    msq = jnp.dot(h * h, mavg, preferred_element_type=jnp.float32)
    var = jnp.maximum(msq - mu * mu, 0.0)
    return (h - mu) * jax.lax.rsqrt(var + LN_EPS) * gamma + beta


def _pack_row(vals):
    """Pack a short list of scalars into lanes 0..k-1 of a (1, 128) row."""
    lane = jax.lax.broadcasted_iota(jnp.int32, (1, LANE), 1)
    row = jnp.zeros((1, LANE), jnp.float32)
    for i, v in enumerate(vals):
        row = row + jnp.where(lane == i, v, 0.0)
    return row


# ---------------------------------------------------------------------------
# fused kernel: MLM + POS streaming path every step, tiny heads on step 0
# ---------------------------------------------------------------------------
def _fused_heads_kernel(x_ref, lab_ref, wtr_ref, ln_ref, wcls_ref,
                        pooled_ref, rlab_ref, rcls_ref,
                        pairx_ref, plab_ref, wpair_ref, plns_ref, pcls_ref,
                        out_ref):
    H2 = 2 * HIDDEN
    H4 = 4 * HIDDEN

    # ----- MLM + POS token stream (the only part that scales with N) -----
    x = x_ref[...].astype(jnp.float32)                       # (T, 32) bf16 -> f32
    b_tr = ln_ref[H2:H2 + 1, :]
    gamma = ln_ref[H2 + 1:H2 + 2, :]
    beta = ln_ref[H2 + 2:H2 + 3, :]
    # one fused transform matmul for both heads: (T,32) @ (32,64)
    h = _gelu(jnp.dot(x, wtr_ref[...], preferred_element_type=jnp.float32) + b_tr)
    hn = _grouped_layernorm(h, ln_ref[0:H2, :], gamma, beta)  # (T, 64)
    # block-diagonal decoder + POS classifier: (T,64) @ (64,256)
    logits = (jnp.dot(hn, wcls_ref[0:H2, :], preferred_element_type=jnp.float32)
              + wcls_ref[H2:H2 + 1, :])
    m_loss, m_valid = _ce_rows(logits[:, :VOCAB], lab_ref[:, 0:1])
    p_loss, p_valid = _ce_rows(logits[:, VOCAB:], lab_ref[:, 1:2])

    main_row = _pack_row([jnp.sum(m_loss), jnp.sum(m_valid),
                          jnp.sum(p_loss), jnp.sum(p_valid)])
    sub = jax.lax.broadcasted_iota(jnp.int32, (8, LANE), 0)
    out_ref[...] = jnp.where(sub == 0, main_row, 0.0)

    # ----- rating / direction / distance heads: only on grid step 0 -----
    @pl.when(pl.program_id(0) == 0)
    def _small_heads():
        # rating head: Linear(H, 5 padded to 128) -> CE
        r_logits = (jnp.dot(pooled_ref[...], rcls_ref[0:HIDDEN, :],
                            preferred_element_type=jnp.float32)
                    + rcls_ref[HIDDEN:HIDDEN + 1, :])
        r_loss, r_valid = _ce_rows(r_logits, rlab_ref[...])

        # four pair transforms in one block-diag matmul + grouped LayerNorm
        px = pairx_ref[...]                                   # (P, 128)
        pb = plns_ref[H4:H4 + 1, :]
        pg = plns_ref[H4 + 1:H4 + 2, :]
        pbe = plns_ref[H4 + 2:H4 + 3, :]
        ph = _gelu(jnp.dot(px, wpair_ref[...],
                           preferred_element_type=jnp.float32) + pb)
        phn = _grouped_layernorm(ph, plns_ref[0:H4, :], pg, pbe)

        t1 = phn[:, 0:HIDDEN]
        t2 = phn[:, HIDDEN:2 * HIDDEN]
        d1 = phn[:, 2 * HIDDEN:3 * HIDDEN]
        d2 = phn[:, 3 * HIDDEN:4 * HIDDEN]
        dir_feats = jnp.concatenate([t1, t2, t1 - t2, t1 * t2], axis=1)
        dis_feats = jnp.concatenate([d1, d2, d1 - d2, d1 * d2], axis=1)
        feats = jnp.concatenate([dir_feats, dis_feats], axis=0)      # (2P, 128)
        # one classifier matmul for both pair heads: (2P,128) @ (128,256)
        cls = (jnp.dot(feats, pcls_ref[0:H4, :],
                       preferred_element_type=jnp.float32)
               + pcls_ref[H4:H4 + 1, :])

        P = px.shape[0]
        d_logit = cls[0:P, 0:1]                                       # direction
        s_logits = cls[P:2 * P, VOCAB:]                               # distance

        d_raw = plab_ref[:, 0:1]
        d_valid = d_raw >= 0                                          # -1 = pad
        y = jnp.where(d_valid, d_raw, 0).astype(jnp.float32)
        bce = (jnp.maximum(d_logit, 0.0) - d_logit * y
               + _log1p_stable(jnp.exp(-jnp.abs(d_logit))))
        d_loss = jnp.where(d_valid, bce, 0.0)
        d_cnt = jnp.sum(d_valid.astype(jnp.float32))

        s_loss, s_valid = _ce_rows(s_logits, plab_ref[:, 1:2])

        out_ref[1:2, :] = _pack_row([
            jnp.sum(r_loss), jnp.sum(r_valid),
            jnp.sum(d_loss), d_cnt,
            jnp.sum(s_loss), jnp.sum(s_valid)])


# ---------------------------------------------------------------------------
# host-side packing helpers
# ---------------------------------------------------------------------------
def _round_up(n, m):
    return ((n + m - 1) // m) * m


def _pad_classifier(w, b, width=LANE):
    """Pad a narrow classifier to `width` lanes (zero weights, -1e30 bias)."""
    h, c = w.shape
    wp = jnp.zeros((h, width), jnp.float32).at[:, :c].set(w)
    bp = jnp.full((1, width), NEG_BIG, jnp.float32).at[0, :c].set(b)
    return wp, bp


def _group_avg_matrix(groups, width=HIDDEN):
    """Block matrix so that h @ M gives, in every lane, the mean of its group."""
    return jnp.kron(jnp.eye(groups, dtype=jnp.float32),
                    jnp.ones((width, width), jnp.float32) / width)


def _build_slabs(params):
    """Pack all head parameters into a few lane-dense slabs (weight + bias row)."""
    mw1, mb1, mg, mbe = params["mlm_tr"]
    pw1, pb1, pg, pbe = params["pos_tr"]
    wtr = jnp.concatenate([mw1, pw1], axis=1)                         # (32, 64)
    ln_slab = jnp.concatenate([
        _group_avg_matrix(2),
        jnp.concatenate([mb1, pb1])[None, :],
        jnp.concatenate([mg, pg])[None, :],
        jnp.concatenate([mbe, pbe])[None, :]], axis=0)                # (67, 64)

    pcw, pcb = _pad_classifier(params["pos_cls_w"], params["pos_cls_b"])
    mdw = params["mlm_dec_w"]
    mdb = params["mlm_dec_b"][None, :]
    zeros = jnp.zeros((HIDDEN, LANE), jnp.float32)
    wcls_slab = jnp.concatenate([
        jnp.concatenate([mdw, zeros], axis=1),
        jnp.concatenate([zeros, pcw], axis=1),
        jnp.concatenate([mdb, pcb], axis=1)], axis=0)                 # (65, 256)

    rw, rb = _pad_classifier(params["rating_w"], params["rating_b"])
    rcls_slab = jnp.concatenate([rw, rb], axis=0)                     # (33, 128)

    dw1a, db1a, dga, dba = params["dir_tr1"]
    dw1b, db1b, dgb, dbb = params["dir_tr2"]
    sw1a, sb1a, sga, sba = params["dis_tr1"]
    sw1b, sb1b, sgb, sbb = params["dis_tr2"]
    wpair = jnp.zeros((4 * HIDDEN, 4 * HIDDEN), jnp.float32)
    for i, w in enumerate([dw1a, dw1b, sw1a, sw1b]):
        wpair = wpair.at[i * HIDDEN:(i + 1) * HIDDEN,
                         i * HIDDEN:(i + 1) * HIDDEN].set(w)
    plns_slab = jnp.concatenate([
        _group_avg_matrix(4),
        jnp.concatenate([db1a, db1b, sb1a, sb1b])[None, :],
        jnp.concatenate([dga, dgb, sga, sgb])[None, :],
        jnp.concatenate([dba, dbb, sba, sbb])[None, :]], axis=0)      # (131, 128)

    dcw = jnp.zeros((4 * HIDDEN, LANE), jnp.float32).at[:, 0:1].set(
        params["dir_cls_w"])
    dcb = jnp.zeros((1, LANE), jnp.float32).at[0, 0].set(params["dir_cls_b"][0])
    scw, scb = _pad_classifier(params["dis_cls_w"], params["dis_cls_b"])
    pcls_slab = jnp.concatenate([
        jnp.concatenate([dcw, scw], axis=1),
        jnp.concatenate([dcb, scb], axis=1)], axis=0)                 # (129, 256)

    return dict(wtr=wtr, ln=ln_slab, wcls=wcls_slab, rcls=rcls_slab,
                wpair=wpair, plns=plns_slab, pcls=pcls_slab)


# ---------------------------------------------------------------------------
# pallas_call wrapper
# ---------------------------------------------------------------------------
def fused_heads(x_tokens, labels2, pooled, rlab, pair_x, pair_lab, slabs):
    N, H = x_tokens.shape
    tile = min(MAX_TILE, _round_up(max(N, 1), 16))      # 16-row align for bf16
    pad = (-N) % tile
    if pad:
        x_tokens = jnp.pad(x_tokens, ((0, pad), (0, 0)))
        labels2 = jnp.pad(labels2, ((0, pad), (0, 0)), constant_values=-100)
    Np = x_tokens.shape[0]
    G = Np // tile
    B = pooled.shape[0]
    P = pair_x.shape[0]

    const = lambda i: (0, 0)
    out = pl.pallas_call(
        _fused_heads_kernel,
        grid=(G,),
        in_specs=[
            pl.BlockSpec((tile, H), lambda i: (i, 0)),          # x (bf16)
            pl.BlockSpec((tile, 2), lambda i: (i, 0)),          # [mlm, pos] labels
            pl.BlockSpec(slabs["wtr"].shape, const),
            pl.BlockSpec(slabs["ln"].shape, const),
            pl.BlockSpec(slabs["wcls"].shape, const),
            pl.BlockSpec((B, H), const),                        # pooled
            pl.BlockSpec((B, 1), const),                        # rating labels
            pl.BlockSpec(slabs["rcls"].shape, const),
            pl.BlockSpec((P, 4 * H), const),                    # [t1|t2|d1|d2]
            pl.BlockSpec((P, 2), const),                        # [dir_y, dis_lab]
            pl.BlockSpec(slabs["wpair"].shape, const),
            pl.BlockSpec(slabs["plns"].shape, const),
            pl.BlockSpec(slabs["pcls"].shape, const),
        ],
        out_specs=pl.BlockSpec((8, LANE), lambda i: (i, 0)),
        out_shape=jax.ShapeDtypeStruct((8 * G, LANE), jnp.float32),
        compiler_params=pltpu.CompilerParams(
            dimension_semantics=("parallel",),
            vmem_limit_bytes=48 * 1024 * 1024),
    )(x_tokens, labels2, slabs["wtr"], slabs["ln"], slabs["wcls"],
      pooled, rlab, slabs["rcls"], pair_x, pair_lab,
      slabs["wpair"], slabs["plns"], slabs["pcls"])

    out3 = out.reshape(G, 8, LANE)
    main = jnp.sum(out3[:, 0, :], axis=0)        # partial sums over grid steps
    small = out3[0, 1, :]                        # step-0 tiny-head sums
    return {
        "mlm_loss": main[0] / main[1],
        "rat_loss": small[0] / small[1],
        "dir_loss": small[2] / small[3],
        "dis_loss": small[4] / small[5],
        "pos_loss": main[2] / main[3],
    }


# ---------------------------------------------------------------------------
# full forward (mirrors PreTrainingHeads.forward)
# ---------------------------------------------------------------------------
def pretraining_heads_forward(params, sequence_output, pooled_output,
                              mlm_labels, rating_labels,
                              dir_batch, dir_token, dir_head,
                              pos_labels, dis_batch, dis_token1, dis_token2,
                              dis_labels, rng):
    B, S, H = sequence_output.shape
    seq2d = sequence_output.reshape(B * S, H)
    x_bf16 = seq2d.astype(jnp.bfloat16)          # halve HBM traffic of the stream
    labels2 = jnp.stack([mlm_labels.reshape(-1), pos_labels.reshape(-1)],
                        axis=1).astype(jnp.int32)

    # --- pair gathers (plain-JAX glue, a handful of rows) ---
    t1 = sequence_output[dir_batch, dir_token]
    t2 = sequence_output[dir_batch, dir_head]
    Pd = t1.shape[0]
    # jit-safe equivalent of torch's boolean-mask shuffle: BCE mean is
    # permutation-invariant, so swap element-wise and label with the mask.
    swap = jax.random.bernoulli(rng, 0.5, (Pd,))
    t1_ = jnp.where(swap[:, None], t1, t2)
    t2_ = jnp.where(swap[:, None], t2, t1)
    d1 = sequence_output[dis_batch, dis_token1]
    d2 = sequence_output[dis_batch, dis_token2]
    Ps = d1.shape[0]

    P = max(Pd, Ps)
    rpad = lambda a: jnp.pad(a, ((0, P - a.shape[0]), (0, 0)))
    pair_x = jnp.concatenate([rpad(t1_), rpad(t2_), rpad(d1), rpad(d2)],
                             axis=1).astype(jnp.float32)          # (P, 4H)
    dir_col = jnp.pad(swap.astype(jnp.int32), (0, P - Pd), constant_values=-1)
    dis_col = jnp.pad(dis_labels.astype(jnp.int32), (0, P - Ps),
                      constant_values=-100)
    pair_lab = jnp.stack([dir_col, dis_col], axis=1)

    slabs = _build_slabs(params)
    return fused_heads(x_bf16, labels2,
                       pooled_output.astype(jnp.float32),
                       rating_labels.reshape(-1, 1).astype(jnp.int32),
                       pair_x, pair_lab, slabs)


# ---------------------------------------------------------------------------
# parameters (deterministic synthetic init; Linear weights stored as (in, out))
# ---------------------------------------------------------------------------
def init_params(key):
    keys = iter(jax.random.split(key, 16))

    def lin_w(din, dout):
        return jax.random.normal(next(keys), (din, dout), jnp.float32) * 0.02

    def tr_params():
        return (lin_w(HIDDEN, HIDDEN),
                jnp.zeros((HIDDEN,), jnp.float32),   # dense bias
                jnp.ones((HIDDEN,), jnp.float32),    # LayerNorm gamma
                jnp.zeros((HIDDEN,), jnp.float32))   # LayerNorm beta

    return {
        "mlm_tr": tr_params(),
        "mlm_dec_w": lin_w(HIDDEN, VOCAB),
        "mlm_dec_b": jnp.zeros((VOCAB,), jnp.float32),
        "rating_w": lin_w(HIDDEN, N_RATING),
        "rating_b": jnp.zeros((N_RATING,), jnp.float32),
        "dir_tr1": tr_params(),
        "dir_tr2": tr_params(),
        "dir_cls_w": lin_w(4 * HIDDEN, 1),
        "dir_cls_b": jnp.zeros((1,), jnp.float32),
        "dis_tr1": tr_params(),
        "dis_tr2": tr_params(),
        "dis_cls_w": lin_w(4 * HIDDEN, N_DIS),
        "dis_cls_b": jnp.zeros((N_DIS,), jnp.float32),
        "pos_tr": tr_params(),
        "pos_cls_w": lin_w(HIDDEN, N_POS),
        "pos_cls_b": jnp.zeros((N_POS,), jnp.float32),
    }


# ---------------------------------------------------------------------------
if __name__ == "__main__":
    key = jax.random.PRNGKey(0)
    (k_param, k_seq, k_pool, k_mlm, k_rat,
     k_pos, k_dis, k_dir) = jax.random.split(key, 8)

    B, S, H = 2, 8, HIDDEN
    params = init_params(k_param)

    sequence_output = jax.random.normal(k_seq, (B, S, H), jnp.float32)
    pooled_output = jax.random.normal(k_pool, (B, H), jnp.float32)

    mlm_labels = jax.random.randint(k_mlm, (B, S), 0, VOCAB)
    mlm_labels = mlm_labels.at[:, ::2].set(-100)          # some ignored positions
    rating_labels = jax.random.randint(k_rat, (B,), 0, N_RATING)
    pos_labels = jax.random.randint(k_pos, (B, S), 0, N_POS)

    dir_batch = jnp.array([0, 0, 1, 1], jnp.int32)
    dir_token = jnp.array([1, 3, 2, 5], jnp.int32)
    dir_head = jnp.array([0, 2, 0, 4], jnp.int32)

    dis_batch = jnp.array([0, 1, 1, 0], jnp.int32)
    dis_token1 = jnp.array([2, 1, 6, 7], jnp.int32)
    dis_token2 = jnp.array([5, 4, 0, 3], jnp.int32)
    dis_labels = jax.random.randint(k_dis, (4,), 0, N_DIS)

    fwd = jax.jit(pretraining_heads_forward)
    losses = fwd(params, sequence_output, pooled_output,
                 mlm_labels, rating_labels,
                 dir_batch, dir_token, dir_head,
                 pos_labels, dis_batch, dis_token1, dis_token2,
                 dis_labels, k_dir)

    jax.block_until_ready(losses)
    print("KERNEL_OK")
</pallas_src>

<mosaic_0001>
module attributes {stable_mosaic.version = 11 : i64} {
  func.func @_fused_heads_kernel(%arg0: i32, %arg1: memref<16x32xbf16, #tpu.memory_space<vmem>>, %arg2: memref<16x2xi32, #tpu.memory_space<vmem>>, %arg3: memref<32x64xf32, #tpu.memory_space<vmem>>, %arg4: memref<67x64xf32, #tpu.memory_space<vmem>>, %arg5: memref<65x256xf32, #tpu.memory_space<vmem>>, %arg6: memref<2x32xf32, #tpu.memory_space<vmem>>, %arg7: memref<2x1xi32, #tpu.memory_space<vmem>>, %arg8: memref<33x128xf32, #tpu.memory_space<vmem>>, %arg9: memref<4x128xf32, #tpu.memory_space<vmem>>, %arg10: memref<4x2xi32, #tpu.memory_space<vmem>>, %arg11: memref<128x128xf32, #tpu.memory_space<vmem>>, %arg12: memref<131x128xf32, #tpu.memory_space<vmem>>, %arg13: memref<129x256xf32, #tpu.memory_space<vmem>>, %arg14: memref<8x128xf32, #tpu.memory_space<vmem>>) attributes {dimension_semantics = [#tpu.dimension_semantics<parallel>], iteration_bounds = array<i64: 1>, scalar_prefetch = 0 : i64, scratch_operands = 0 : i64, tpu.core_type = #tpu.core_type<tc>, window_params = [{transform_indices = @transform_0, window_bounds = array<i64: 16, 32>}, {transform_indices = @transform_1, window_bounds = array<i64: 16, 2>}, {pipeline_mode = #tpu.pipeline_mode<synchronous>, transform_indices = @transform_2, window_bounds = array<i64: 32, 64>}, {pipeline_mode = #tpu.pipeline_mode<synchronous>, transform_indices = @transform_3, window_bounds = array<i64: 67, 64>}, {pipeline_mode = #tpu.pipeline_mode<synchronous>, transform_indices = @transform_4, window_bounds = array<i64: 65, 256>}, {pipeline_mode = #tpu.pipeline_mode<synchronous>, transform_indices = @transform_5, window_bounds = array<i64: 2, 32>}, {pipeline_mode = #tpu.pipeline_mode<synchronous>, transform_indices = @transform_6, window_bounds = array<i64: 2, 1>}, {pipeline_mode = #tpu.pipeline_mode<synchronous>, transform_indices = @transform_7, window_bounds = array<i64: 33, 128>}, {pipeline_mode = #tpu.pipeline_mode<synchronous>, transform_indices = @transform_8, window_bounds = array<i64: 4, 128>}, {pipeline_mode = #tpu.pipeline_mode<synchronous>, transform_indices = @transform_9, window_bounds = array<i64: 4, 2>}, {pipeline_mode = #tpu.pipeline_mode<synchronous>, transform_indices = @transform_10, window_bounds = array<i64: 128, 128>}, {pipeline_mode = #tpu.pipeline_mode<synchronous>, transform_indices = @transform_11, window_bounds = array<i64: 131, 128>}, {pipeline_mode = #tpu.pipeline_mode<synchronous>, transform_indices = @transform_12, window_bounds = array<i64: 129, 256>}, {transform_indices = @transform_13, window_bounds = array<i64: 8, 128>}]} {
    %c0 = arith.constant 0 : index
    %c0_0 = arith.constant 0 : index
    %0 = vector.load %arg1[%c0, %c0_0] : memref<16x32xbf16, #tpu.memory_space<vmem>>, vector<16x32xbf16>
    %1 = arith.extf %0 : vector<16x32xbf16> to vector<16x32xf32>
    %c64 = arith.constant 64 : index
    %c0_1 = arith.constant 0 : index
    %2 = vector.load %arg4[%c64, %c0_1] : memref<67x64xf32, #tpu.memory_space<vmem>>, vector<1x64xf32>
    %c65 = arith.constant 65 : index
    %c0_2 = arith.constant 0 : index
    %3 = vector.load %arg4[%c65, %c0_2] : memref<67x64xf32, #tpu.memory_space<vmem>>, vector<1x64xf32>
    %c66 = arith.constant 66 : index
    %c0_3 = arith.constant 0 : index
    %4 = vector.load %arg4[%c66, %c0_3] : memref<67x64xf32, #tpu.memory_space<vmem>>, vector<1x64xf32>
    %c0_4 = arith.constant 0 : index
    %c0_5 = arith.constant 0 : index
    %5 = vector.load %arg3[%c0_4, %c0_5] : memref<32x64xf32, #tpu.memory_space<vmem>>, vector<32x64xf32>
    %cst = arith.constant dense<0.000000e+00> : vector<16x64xf32>
    %6 = tpu.matmul %1, %5, %cst {dimension_numbers = #tpu.dot_dimension_numbers<[1], [0], [0], [1], [0, 0, 1, 1], [], []>} : vector<16x32xf32>, vector<32x64xf32>, vector<16x64xf32> -> vector<16x64xf32>
    %7 = vector.broadcast %2 : vector<1x64xf32> to vector<16x64xf32>
    %8 = arith.addf %6, %7 : vector<16x64xf32>
    %9 = arith.mulf %8, %8 : vector<16x64xf32>
    %10 = arith.mulf %8, %9 : vector<16x64xf32>
    %cst_6 = arith.constant 4.471500e-02 : f32
    %11 = vector.broadcast %cst_6 : f32 to vector<16x64xf32>
    %12 = arith.mulf %11, %10 : vector<16x64xf32>
    %13 = arith.addf %8, %12 : vector<16x64xf32>
    %cst_7 = arith.constant 0.797884583 : f32
    %14 = vector.broadcast %cst_7 : f32 to vector<16x64xf32>
    %15 = arith.mulf %14, %13 : vector<16x64xf32>
    %16 = math.tanh %15 : vector<16x64xf32>
    %cst_8 = arith.constant 1.000000e+00 : f32
    %17 = vector.broadcast %cst_8 : f32 to vector<16x64xf32>
    %18 = arith.addf %17, %16 : vector<16x64xf32>
    %cst_9 = arith.constant 5.000000e-01 : f32
    %19 = vector.broadcast %cst_9 : f32 to vector<16x64xf32>
    %20 = arith.mulf %19, %18 : vector<16x64xf32>
    %21 = arith.mulf %8, %20 : vector<16x64xf32>
    %c0_10 = arith.constant 0 : index
    %c0_11 = arith.constant 0 : index
    %22 = vector.load %arg4[%c0_10, %c0_11] : memref<67x64xf32, #tpu.memory_space<vmem>>, vector<64x64xf32>
    %cst_12 = arith.constant dense<0.000000e+00> : vector<16x64xf32>
    %23 = tpu.matmul %21, %22, %cst_12 {dimension_numbers = #tpu.dot_dimension_numbers<[1], [0], [0], [1], [0, 0, 1, 1], [], []>} : vector<16x64xf32>, vector<64x64xf32>, vector<16x64xf32> -> vector<16x64xf32>
    %24 = arith.mulf %21, %21 : vector<16x64xf32>
    %cst_13 = arith.constant dense<0.000000e+00> : vector<16x64xf32>
    %25 = tpu.matmul %24, %22, %cst_13 {dimension_numbers = #tpu.dot_dimension_numbers<[1], [0], [0], [1], [0, 0, 1, 1], [], []>} : vector<16x64xf32>, vector<64x64xf32>, vector<16x64xf32> -> vector<16x64xf32>
    %26 = arith.mulf %23, %23 : vector<16x64xf32>
    %27 = arith.subf %25, %26 : vector<16x64xf32>
    %cst_14 = arith.constant 0.000000e+00 : f32
    %28 = vector.broadcast %cst_14 : f32 to vector<16x64xf32>
    %29 = arith.maximumf %27, %28 : vector<16x64xf32>
    %30 = arith.subf %21, %23 : vector<16x64xf32>
    %cst_15 = arith.constant 9.99999996E-13 : f32
    %31 = vector.broadcast %cst_15 : f32 to vector<16x64xf32>
    %32 = arith.addf %29, %31 : vector<16x64xf32>
    %33 = math.rsqrt %32 : vector<16x64xf32>
    %34 = arith.mulf %30, %33 : vector<16x64xf32>
    %35 = vector.broadcast %3 : vector<1x64xf32> to vector<16x64xf32>
    %36 = arith.mulf %34, %35 : vector<16x64xf32>
    %37 = vector.broadcast %4 : vector<1x64xf32> to vector<16x64xf32>
    %38 = arith.addf %36, %37 : vector<16x64xf32>
    %c0_16 = arith.constant 0 : index
    %c0_17 = arith.constant 0 : index
    %39 = vector.load %arg5[%c0_16, %c0_17] : memref<65x256xf32, #tpu.memory_space<vmem>>, vector<64x256xf32>
    %cst_18 = arith.constant dense<0.000000e+00> : vector<16x256xf32>
    %40 = tpu.matmul %38, %39, %cst_18 {dimension_numbers = #tpu.dot_dimension_numbers<[1], [0], [0], [1], [0, 0, 1, 1], [], []>} : vector<16x64xf32>, vector<64x256xf32>, vector<16x256xf32> -> vector<16x256xf32>
    %c64_19 = arith.constant 64 : index
    %c0_20 = arith.constant 0 : index
    %41 = vector.load %arg5[%c64_19, %c0_20] : memref<65x256xf32, #tpu.memory_space<vmem>>, vector<1x256xf32>
    %42 = vector.broadcast %41 : vector<1x256xf32> to vector<16x256xf32>
    %43 = arith.addf %40, %42 : vector<16x256xf32>
    %44 = vector.extract_strided_slice %43 {offsets = [0, 0], sizes = [16, 128], strides = [1, 1]} : vector<16x256xf32> to vector<16x128xf32>
    %c0_21 = arith.constant 0 : index
    %c0_22 = arith.constant 0 : index
    %45 = vector.load %arg2[%c0_21, %c0_22] : memref<16x2xi32, #tpu.memory_space<vmem>>, vector<16x1xi32>
    %cst_23 = arith.constant dense<0xFF800000> : vector<16xf32>
    %46 = vector.multi_reduction <maximumf>, %44, %cst_23 [1] : vector<16x128xf32> to vector<16xf32>
    %47 = vector.shape_cast %46 : vector<16xf32> to vector<16x1xf32>
    %48 = vector.broadcast %47 : vector<16x1xf32> to vector<16x128xf32>
    %49 = arith.subf %44, %48 : vector<16x128xf32>
    %50 = math.exp %49 : vector<16x128xf32>
    %cst_24 = arith.constant dense<0.000000e+00> : vector<16xf32>
    %51 = vector.multi_reduction <add>, %50, %cst_24 [1] : vector<16x128xf32> to vector<16xf32>
    %52 = vector.shape_cast %51 : vector<16xf32> to vector<16x1xf32>
    %53 = math.log %52 : vector<16x1xf32>
    %54 = arith.addf %47, %53 : vector<16x1xf32>
    %55 = tpu.iota {dimensions = array<i32: 1>} : vector<16x128xi32>
    %56 = vector.broadcast %45 : vector<16x1xi32> to vector<16x128xi32>
    %57 = arith.cmpi eq, %55, %56 : vector<16x128xi32>
    %cst_25 = arith.constant 0.000000e+00 : f32
    %58 = vector.broadcast %cst_25 : f32 to vector<16x128xf32>
    %59 = arith.select %57, %44, %58 : vector<16x128xi1>, vector<16x128xf32>
    %cst_26 = arith.constant dense<0.000000e+00> : vector<16xf32>
    %60 = vector.multi_reduction <add>, %59, %cst_26 [1] : vector<16x128xf32> to vector<16xf32>
    %61 = vector.shape_cast %60 : vector<16xf32> to vector<16x1xf32>
    %c-100_i32 = arith.constant -100 : i32
    %62 = vector.broadcast %c-100_i32 : i32 to vector<16x1xi32>
    %63 = arith.cmpi ne, %45, %62 : vector<16x1xi32>
    %64 = arith.subf %54, %61 : vector<16x1xf32>
    %cst_27 = arith.constant 0.000000e+00 : f32
    %65 = vector.broadcast %cst_27 : f32 to vector<16x1xf32>
    %66 = arith.select %63, %64, %65 : vector<16x1xi1>, vector<16x1xf32>
    %67 = arith.extui %63 : vector<16x1xi1> to vector<16x1xi32>
    %68 = arith.sitofp %67 : vector<16x1xi32> to vector<16x1xf32>
    %69 = vector.extract_strided_slice %43 {offsets = [0, 128], sizes = [16, 128], strides = [1, 1]} : vector<16x256xf32> to vector<16x128xf32>
    %c0_28 = arith.constant 0 : index
    %c1 = arith.constant 1 : index
    %70 = vector.load %arg2[%c0_28, %c1] : memref<16x2xi32, #tpu.memory_space<vmem>>, vector<16x1xi32>
    %cst_29 = arith.constant dense<0xFF800000> : vector<16xf32>
    %71 = vector.multi_reduction <maximumf>, %69, %cst_29 [1] : vector<16x128xf32> to vector<16xf32>
    %72 = vector.shape_cast %71 : vector<16xf32> to vector<16x1xf32>
    %73 = vector.broadcast %72 : vector<16x1xf32> to vector<16x128xf32>
    %74 = arith.subf %69, %73 : vector<16x128xf32>
    %75 = math.exp %74 : vector<16x128xf32>
    %cst_30 = arith.constant dense<0.000000e+00> : vector<16xf32>
    %76 = vector.multi_reduction <add>, %75, %cst_30 [1] : vector<16x128xf32> to vector<16xf32>
    %77 = vector.shape_cast %76 : vector<16xf32> to vector<16x1xf32>
    %78 = math.log %77 : vector<16x1xf32>
    %79 = arith.addf %72, %78 : vector<16x1xf32>
    %80 = tpu.iota {dimensions = array<i32: 1>} : vector<16x128xi32>
    %81 = vector.broadcast %70 : vector<16x1xi32> to vector<16x128xi32>
    %82 = arith.cmpi eq, %80, %81 : vector<16x128xi32>
    %cst_31 = arith.constant 0.000000e+00 : f32
    %83 = vector.broadcast %cst_31 : f32 to vector<16x128xf32>
    %84 = arith.select %82, %69, %83 : vector<16x128xi1>, vector<16x128xf32>
    %cst_32 = arith.constant dense<0.000000e+00> : vector<16xf32>
    %85 = vector.multi_reduction <add>, %84, %cst_32 [1] : vector<16x128xf32> to vector<16xf32>
    %86 = vector.shape_cast %85 : vector<16xf32> to vector<16x1xf32>
    %c-100_i32_33 = arith.constant -100 : i32
    %87 = vector.broadcast %c-100_i32_33 : i32 to vector<16x1xi32>
    %88 = arith.cmpi ne, %70, %87 : vector<16x1xi32>
    %89 = arith.subf %79, %86 : vector<16x1xf32>
    %cst_34 = arith.constant 0.000000e+00 : f32
    %90 = vector.broadcast %cst_34 : f32 to vector<16x1xf32>
    %91 = arith.select %88, %89, %90 : vector<16x1xi1>, vector<16x1xf32>
    %92 = arith.extui %88 : vector<16x1xi1> to vector<16x1xi32>
    %93 = arith.sitofp %92 : vector<16x1xi32> to vector<16x1xf32>
    %94 = vector.shape_cast %66 : vector<16x1xf32> to vector<1x16x1xf32>
    %cst_35 = arith.constant dense<0.000000e+00> : vector<1xf32>
    %95 = vector.multi_reduction <add>, %94, %cst_35 [1, 2] : vector<1x16x1xf32> to vector<1xf32>
    %96 = vector.shape_cast %95 : vector<1xf32> to vector<1x1x1xf32>
    %97 = vector.extract %96[0, 0, 0] : f32 from vector<1x1x1xf32>
    %98 = vector.shape_cast %68 : vector<16x1xf32> to vector<1x16x1xf32>
    %cst_36 = arith.constant dense<0.000000e+00> : vector<1xf32>
    %99 = vector.multi_reduction <add>, %98, %cst_36 [1, 2] : vector<1x16x1xf32> to vector<1xf32>
    %100 = vector.shape_cast %99 : vector<1xf32> to vector<1x1x1xf32>
    %101 = vector.extract %100[0, 0, 0] : f32 from vector<1x1x1xf32>
    %102 = vector.shape_cast %91 : vector<16x1xf32> to vector<1x16x1xf32>
    %cst_37 = arith.constant dense<0.000000e+00> : vector<1xf32>
    %103 = vector.multi_reduction <add>, %102, %cst_37 [1, 2] : vector<1x16x1xf32> to vector<1xf32>
    %104 = vector.shape_cast %103 : vector<1xf32> to vector<1x1x1xf32>
    %105 = vector.extract %104[0, 0, 0] : f32 from vector<1x1x1xf32>
    %106 = vector.shape_cast %93 : vector<16x1xf32> to vector<1x16x1xf32>
    %cst_38 = arith.constant dense<0.000000e+00> : vector<1xf32>
    %107 = vector.multi_reduction <add>, %106, %cst_38 [1, 2] : vector<1x16x1xf32> to vector<1xf32>
    %108 = vector.shape_cast %107 : vector<1xf32> to vector<1x1x1xf32>
    %109 = vector.extract %108[0, 0, 0] : f32 from vector<1x1x1xf32>
    %110 = tpu.iota {dimensions = array<i32: 1>} : vector<1x128xi32>
    %cst_39 = arith.constant 0.000000e+00 : f32
    %111 = vector.broadcast %cst_39 : f32 to vector<1x128xf32>
    %c0_i32 = arith.constant 0 : i32
    %112 = vector.broadcast %c0_i32 : i32 to vector<1x128xi32>
    %113 = arith.cmpi eq, %110, %112 : vector<1x128xi32>
    %cst_40 = arith.constant 0.000000e+00 : f32
    %114 = vector.broadcast %97 : f32 to vector<1x128xf32>
    %115 = vector.broadcast %cst_40 : f32 to vector<1x128xf32>
    %116 = arith.select %113, %114, %115 : vector<1x128xi1>, vector<1x128xf32>
    %117 = arith.addf %111, %116 : vector<1x128xf32>
    %c1_i32 = arith.constant 1 : i32
    %118 = vector.broadcast %c1_i32 : i32 to vector<1x128xi32>
    %119 = arith.cmpi eq, %110, %118 : vector<1x128xi32>
    %cst_41 = arith.constant 0.000000e+00 : f32
    %120 = vector.broadcast %101 : f32 to vector<1x128xf32>
    %121 = vector.broadcast %cst_41 : f32 to vector<1x128xf32>
    %122 = arith.select %119, %120, %121 : vector<1x128xi1>, vector<1x128xf32>
    %123 = arith.addf %117, %122 : vector<1x128xf32>
    %c2_i32 = arith.constant 2 : i32
    %124 = vector.broadcast %c2_i32 : i32 to vector<1x128xi32>
    %125 = arith.cmpi eq, %110, %124 : vector<1x128xi32>
    %cst_42 = arith.constant 0.000000e+00 : f32
    %126 = vector.broadcast %105 : f32 to vector<1x128xf32>
    %127 = vector.broadcast %cst_42 : f32 to vector<1x128xf32>
    %128 = arith.select %125, %126, %127 : vector<1x128xi1>, vector<1x128xf32>
    %129 = arith.addf %123, %128 : vector<1x128xf32>
    %c3_i32 = arith.constant 3 : i32
    %130 = vector.broadcast %c3_i32 : i32 to vector<1x128xi32>
    %131 = arith.cmpi eq, %110, %130 : vector<1x128xi32>
    %cst_43 = arith.constant 0.000000e+00 : f32
    %132 = vector.broadcast %109 : f32 to vector<1x128xf32>
    %133 = vector.broadcast %cst_43 : f32 to vector<1x128xf32>
    %134 = arith.select %131, %132, %133 : vector<1x128xi1>, vector<1x128xf32>
    %135 = arith.addf %129, %134 : vector<1x128xf32>
    %136 = tpu.iota {dimensions = array<i32: 0>} : vector<8x128xi32>
    %c0_i32_44 = arith.constant 0 : i32
    %137 = vector.broadcast %c0_i32_44 : i32 to vector<8x128xi32>
    %138 = arith.cmpi eq, %136, %137 : vector<8x128xi32>
    %cst_45 = arith.constant 0.000000e+00 : f32
    %139 = vector.shape_cast %135 : vector<1x128xf32> to vector<1x128xf32>
    %140 = vector.broadcast %139 : vector<1x128xf32> to vector<8x128xf32>
    %141 = vector.broadcast %cst_45 : f32 to vector<8x128xf32>
    %142 = arith.select %138, %140, %141 : vector<8x128xi1>, vector<8x128xf32>
    %c0_46 = arith.constant 0 : index
    %c0_47 = arith.constant 0 : index
    %143 = vector.load %arg14[%c0_46, %c0_47] : memref<8x128xf32, #tpu.memory_space<vmem>>, vector<8x128xf32>
    tpu.vector_store %arg14[%c0_46, %c0_47], %142 {strides = array<i32>} : memref<8x128xf32, #tpu.memory_space<vmem>>, vector<8x128xf32>,
    %c0_i32_48 = arith.constant 0 : i32
    %144 = arith.cmpi eq, %arg0, %c0_i32_48 : i32
    %145 = arith.extui %144 : i1 to i32
    %c0_i32_49 = arith.constant 0 : i32
    %146 = arith.cmpi ne, %145, %c0_i32_49 : i32
    scf.if %146 {
      %c0_50 = arith.constant 0 : index
      %c0_51 = arith.constant 0 : index
      %147 = vector.load %arg6[%c0_50, %c0_51] : memref<2x32xf32, #tpu.memory_space<vmem>>, vector<2x32xf32>
      %c0_52 = arith.constant 0 : index
      %c0_53 = arith.constant 0 : index
      %148 = vector.load %arg8[%c0_52, %c0_53] : memref<33x128xf32, #tpu.memory_space<vmem>>, vector<32x128xf32>
      %cst_54 = arith.constant dense<0.000000e+00> : vector<2x128xf32>
      %149 = tpu.matmul %147, %148, %cst_54 {dimension_numbers = #tpu.dot_dimension_numbers<[1], [0], [0], [1], [0, 0, 1, 1], [], []>} : vector<2x32xf32>, vector<32x128xf32>, vector<2x128xf32> -> vector<2x128xf32>
      %c32 = arith.constant 32 : index
      %c0_55 = arith.constant 0 : index
      %150 = vector.load %arg8[%c32, %c0_55] : memref<33x128xf32, #tpu.memory_space<vmem>>, vector<1x128xf32>
      %151 = vector.broadcast %150 : vector<1x128xf32> to vector<2x128xf32>
      %152 = arith.addf %149, %151 : vector<2x128xf32>
      %c0_56 = arith.constant 0 : index
      %c0_57 = arith.constant 0 : index
      %153 = vector.load %arg7[%c0_56, %c0_57] : memref<2x1xi32, #tpu.memory_space<vmem>>, vector<2x1xi32>
      %cst_58 = arith.constant dense<0xFF800000> : vector<2xf32>
      %154 = vector.multi_reduction <maximumf>, %152, %cst_58 [1] : vector<2x128xf32> to vector<2xf32>
      %155 = vector.shape_cast %154 : vector<2xf32> to vector<2x1xf32>
      %156 = vector.broadcast %155 : vector<2x1xf32> to vector<2x128xf32>
      %157 = arith.subf %152, %156 : vector<2x128xf32>
      %158 = math.exp %157 : vector<2x128xf32>
      %cst_59 = arith.constant dense<0.000000e+00> : vector<2xf32>
      %159 = vector.multi_reduction <add>, %158, %cst_59 [1] : vector<2x128xf32> to vector<2xf32>
      %160 = vector.shape_cast %159 : vector<2xf32> to vector<2x1xf32>
      %161 = math.log %160 : vector<2x1xf32>
      %162 = arith.addf %155, %161 : vector<2x1xf32>
      %163 = tpu.iota {dimensions = array<i32: 1>} : vector<2x128xi32>
      %164 = vector.broadcast %153 : vector<2x1xi32> to vector<2x128xi32>
      %165 = arith.cmpi eq, %163, %164 : vector<2x128xi32>
      %cst_60 = arith.constant 0.000000e+00 : f32
      %166 = vector.broadcast %cst_60 : f32 to vector<2x128xf32>
      %167 = arith.select %165, %152, %166 : vector<2x128xi1>, vector<2x128xf32>
      %cst_61 = arith.constant dense<0.000000e+00> : vector<2xf32>
      %168 = vector.multi_reduction <add>, %167, %cst_61 [1] : vector<2x128xf32> to vector<2xf32>
      %169 = vector.shape_cast %168 : vector<2xf32> to vector<2x1xf32>
      %c-100_i32_62 = arith.constant -100 : i32
      %170 = vector.broadcast %c-100_i32_62 : i32 to vector<2x1xi32>
      %171 = arith.cmpi ne, %153, %170 : vector<2x1xi32>
      %172 = arith.subf %162, %169 : vector<2x1xf32>
      %cst_63 = arith.constant 0.000000e+00 : f32
      %173 = vector.broadcast %cst_63 : f32 to vector<2x1xf32>
      %174 = arith.select %171, %172, %173 : vector<2x1xi1>, vector<2x1xf32>
      %175 = arith.extui %171 : vector<2x1xi1> to vector<2x1xi32>
      %176 = arith.sitofp %175 : vector<2x1xi32> to vector<2x1xf32>
      %c0_64 = arith.constant 0 : index
      %c0_65 = arith.constant 0 : index
      %177 = vector.load %arg9[%c0_64, %c0_65] : memref<4x128xf32, #tpu.memory_space<vmem>>, vector<4x128xf32>
      %c128 = arith.constant 128 : index
      %c0_66 = arith.constant 0 : index
      %178 = vector.load %arg12[%c128, %c0_66] : memref<131x128xf32, #tpu.memory_space<vmem>>, vector<1x128xf32>
      %c129 = arith.constant 129 : index
      %c0_67 = arith.constant 0 : index
      %179 = vector.load %arg12[%c129, %c0_67] : memref<131x128xf32, #tpu.memory_space<vmem>>, vector<1x128xf32>
      %c130 = arith.constant 130 : index
      %c0_68 = arith.constant 0 : index
      %180 = vector.load %arg12[%c130, %c0_68] : memref<131x128xf32, #tpu.memory_space<vmem>>, vector<1x128xf32>
      %c0_69 = arith.constant 0 : index
      %c0_70 = arith.constant 0 : index
      %181 = vector.load %arg11[%c0_69, %c0_70] : memref<128x128xf32, #tpu.memory_space<vmem>>, vector<128x128xf32>
      %cst_71 = arith.constant dense<0.000000e+00> : vector<4x128xf32>
      %182 = tpu.matmul %177, %181, %cst_71 {dimension_numbers = #tpu.dot_dimension_numbers<[1], [0], [0], [1], [0, 0, 1, 1], [], []>} : vector<4x128xf32>, vector<128x128xf32>, vector<4x128xf32> -> vector<4x128xf32>
      %183 = vector.broadcast %178 : vector<1x128xf32> to vector<4x128xf32>
      %184 = arith.addf %182, %183 : vector<4x128xf32>
      %185 = arith.mulf %184, %184 : vector<4x128xf32>
      %186 = arith.mulf %184, %185 : vector<4x128xf32>
      %cst_72 = arith.constant 4.471500e-02 : f32
      %187 = vector.broadcast %cst_72 : f32 to vector<4x128xf32>
      %188 = arith.mulf %187, %186 : vector<4x128xf32>
      %189 = arith.addf %184, %188 : vector<4x128xf32>
      %cst_73 = arith.constant 0.797884583 : f32
      %190 = vector.broadcast %cst_73 : f32 to vector<4x128xf32>
      %191 = arith.mulf %190, %189 : vector<4x128xf32>
      %192 = math.tanh %191 : vector<4x128xf32>
      %cst_74 = arith.constant 1.000000e+00 : f32
      %193 = vector.broadcast %cst_74 : f32 to vector<4x128xf32>
      %194 = arith.addf %193, %192 : vector<4x128xf32>
      %cst_75 = arith.constant 5.000000e-01 : f32
      %195 = vector.broadcast %cst_75 : f32 to vector<4x128xf32>
      %196 = arith.mulf %195, %194 : vector<4x128xf32>
      %197 = arith.mulf %184, %196 : vector<4x128xf32>
      %c0_76 = arith.constant 0 : index
      %c0_77 = arith.constant 0 : index
      %198 = vector.load %arg12[%c0_76, %c0_77] : memref<131x128xf32, #tpu.memory_space<vmem>>, vector<128x128xf32>
      %cst_78 = arith.constant dense<0.000000e+00> : vector<4x128xf32>
      %199 = tpu.matmul %197, %198, %cst_78 {dimension_numbers = #tpu.dot_dimension_numbers<[1], [0], [0], [1], [0, 0, 1, 1], [], []>} : vector<4x128xf32>, vector<128x128xf32>, vector<4x128xf32> -> vector<4x128xf32>
      %200 = arith.mulf %197, %197 : vector<4x128xf32>
      %cst_79 = arith.constant dense<0.000000e+00> : vector<4x128xf32>
      %201 = tpu.matmul %200, %198, %cst_79 {dimension_numbers = #tpu.dot_dimension_numbers<[1], [0], [0], [1], [0, 0, 1, 1], [], []>} : vector<4x128xf32>, vector<128x128xf32>, vector<4x128xf32> -> vector<4x128xf32>
      %202 = arith.mulf %199, %199 : vector<4x128xf32>
      %203 = arith.subf %201, %202 : vector<4x128xf32>
      %cst_80 = arith.constant 0.000000e+00 : f32
      %204 = vector.broadcast %cst_80 : f32 to vector<4x128xf32>
      %205 = arith.maximumf %203, %204 : vector<4x128xf32>
      %206 = arith.subf %197, %199 : vector<4x128xf32>
      %cst_81 = arith.constant 9.99999996E-13 : f32
      %207 = vector.broadcast %cst_81 : f32 to vector<4x128xf32>
      %208 = arith.addf %205, %207 : vector<4x128xf32>
      %209 = math.rsqrt %208 : vector<4x128xf32>
      %210 = arith.mulf %206, %209 : vector<4x128xf32>
      %211 = vector.broadcast %179 : vector<1x128xf32> to vector<4x128xf32>
      %212 = arith.mulf %210, %211 : vector<4x128xf32>
      %213 = vector.broadcast %180 : vector<1x128xf32> to vector<4x128xf32>
      %214 = arith.addf %212, %213 : vector<4x128xf32>
      %215 = vector.extract_strided_slice %214 {offsets = [0, 0], sizes = [4, 32], strides = [1, 1]} : vector<4x128xf32> to vector<4x32xf32>
      %216 = vector.extract_strided_slice %214 {offsets = [0, 32], sizes = [4, 32], strides = [1, 1]} : vector<4x128xf32> to vector<4x32xf32>
      %217 = vector.extract_strided_slice %214 {offsets = [0, 64], sizes = [4, 32], strides = [1, 1]} : vector<4x128xf32> to vector<4x32xf32>
      %218 = vector.extract_strided_slice %214 {offsets = [0, 96], sizes = [4, 32], strides = [1, 1]} : vector<4x128xf32> to vector<4x32xf32>
      %219 = arith.subf %215, %216 : vector<4x32xf32>
      %220 = arith.mulf %215, %216 : vector<4x32xf32>
      %221 = tpu.concatenate %215, %216, %219, %220 in 1 : vector<4x32xf32>, vector<4x32xf32>, vector<4x32xf32>, vector<4x32xf32> -> vector<4x128xf32>
      %222 = arith.subf %217, %218 : vector<4x32xf32>
      %223 = arith.mulf %217, %218 : vector<4x32xf32>
      %224 = tpu.concatenate %217, %218, %222, %223 in 1 : vector<4x32xf32>, vector<4x32xf32>, vector<4x32xf32>, vector<4x32xf32> -> vector<4x128xf32>
      %225 = tpu.concatenate %221, %224 in 0 : vector<4x128xf32>, vector<4x128xf32> -> vector<8x128xf32>
      %c0_82 = arith.constant 0 : index
      %c0_83 = arith.constant 0 : index
      %226 = vector.load %arg13[%c0_82, %c0_83] : memref<129x256xf32, #tpu.memory_space<vmem>>, vector<128x256xf32>
      %cst_84 = arith.constant dense<0.000000e+00> : vector<8x256xf32>
      %227 = tpu.matmul %225, %226, %cst_84 {dimension_numbers = #tpu.dot_dimension_numbers<[1], [0], [0], [1], [0, 0, 1, 1], [], []>} : vector<8x128xf32>, vector<128x256xf32>, vector<8x256xf32> -> vector<8x256xf32>
      %c128_85 = arith.constant 128 : index
      %c0_86 = arith.constant 0 : index
      %228 = vector.load %arg13[%c128_85, %c0_86] : memref<129x256xf32, #tpu.memory_space<vmem>>, vector<1x256xf32>
      %229 = vector.broadcast %228 : vector<1x256xf32> to vector<8x256xf32>
      %230 = arith.addf %227, %229 : vector<8x256xf32>
      %231 = vector.extract_strided_slice %230 {offsets = [0, 0], sizes = [4, 1], strides = [1, 1]} : vector<8x256xf32> to vector<4x1xf32>
      %232 = vector.extract_strided_slice %230 {offsets = [4, 128], sizes = [4, 128], strides = [1, 1]} : vector<8x256xf32> to vector<4x128xf32>
      %c0_87 = arith.constant 0 : index
      %c0_88 = arith.constant 0 : index
      %233 = vector.load %arg10[%c0_87, %c0_88] : memref<4x2xi32, #tpu.memory_space<vmem>>, vector<4x1xi32>
      %c0_i32_89 = arith.constant 0 : i32
      %234 = vector.broadcast %c0_i32_89 : i32 to vector<4x1xi32>
      %235 = arith.cmpi sge, %233, %234 : vector<4x1xi32>
      %c0_i32_90 = arith.constant 0 : i32
      %236 = vector.broadcast %c0_i32_90 : i32 to vector<4x1xi32>
      %237 = arith.select %235, %233, %236 : vector<4x1xi1>, vector<4x1xi32>
      %238 = arith.sitofp %237 : vector<4x1xi32> to vector<4x1xf32>
      %cst_91 = arith.constant 0.000000e+00 : f32
      %239 = vector.broadcast %cst_91 : f32 to vector<4x1xf32>
      %240 = arith.maximumf %231, %239 : vector<4x1xf32>
      %241 = arith.mulf %231, %238 : vector<4x1xf32>
      %242 = arith.subf %240, %241 : vector<4x1xf32>
      %243 = math.absf %231 : vector<4x1xf32>
      %cst_92 = arith.constant 0.000000e+00 : f32
      %244 = vector.broadcast %cst_92 : f32 to vector<4x1xf32>
      %245 = arith.subf %244, %243 : vector<4x1xf32>
      %246 = math.exp %245 : vector<4x1xf32>
      %cst_93 = arith.constant 9.99999974E-5 : f32
      %247 = vector.broadcast %cst_93 : f32 to vector<4x1xf32>
      %248 = arith.cmpf ogt, %246, %247 : vector<4x1xf32>
      %cst_94 = arith.constant 1.000000e+00 : f32
      %249 = vector.broadcast %cst_94 : f32 to vector<4x1xf32>
      %250 = arith.addf %249, %246 : vector<4x1xf32>
      %251 = math.log %250 : vector<4x1xf32>
      %cst_95 = arith.constant 5.000000e-01 : f32
      %252 = vector.broadcast %cst_95 : f32 to vector<4x1xf32>
      %253 = arith.mulf %252, %246 : vector<4x1xf32>
      %cst_96 = arith.constant 1.000000e+00 : f32
      %254 = vector.broadcast %cst_96 : f32 to vector<4x1xf32>
      %255 = arith.subf %254, %253 : vector<4x1xf32>
      %256 = arith.mulf %246, %255 : vector<4x1xf32>
      %257 = arith.select %248, %251, %256 : vector<4x1xi1>, vector<4x1xf32>
      %258 = arith.addf %242, %257 : vector<4x1xf32>
      %cst_97 = arith.constant 0.000000e+00 : f32
      %259 = vector.broadcast %cst_97 : f32 to vector<4x1xf32>
      %260 = arith.select %235, %258, %259 : vector<4x1xi1>, vector<4x1xf32>
      %261 = arith.extui %235 : vector<4x1xi1> to vector<4x1xi32>
      %262 = arith.sitofp %261 : vector<4x1xi32> to vector<4x1xf32>
      %263 = vector.shape_cast %262 : vector<4x1xf32> to vector<1x4x1xf32>
      %cst_98 = arith.constant dense<0.000000e+00> : vector<1xf32>
      %264 = vector.multi_reduction <add>, %263, %cst_98 [1, 2] : vector<1x4x1xf32> to vector<1xf32>
      %265 = vector.shape_cast %264 : vector<1xf32> to vector<1x1x1xf32>
      %266 = vector.extract %265[0, 0, 0] : f32 from vector<1x1x1xf32>
      %c0_99 = arith.constant 0 : index
      %c1_100 = arith.constant 1 : index
      %267 = vector.load %arg10[%c0_99, %c1_100] : memref<4x2xi32, #tpu.memory_space<vmem>>, vector<4x1xi32>
      %cst_101 = arith.constant dense<0xFF800000> : vector<4xf32>
      %268 = vector.multi_reduction <maximumf>, %232, %cst_101 [1] : vector<4x128xf32> to vector<4xf32>
      %269 = vector.shape_cast %268 : vector<4xf32> to vector<4x1xf32>
      %270 = vector.broadcast %269 : vector<4x1xf32> to vector<4x128xf32>
      %271 = arith.subf %232, %270 : vector<4x128xf32>
      %272 = math.exp %271 : vector<4x128xf32>
      %cst_102 = arith.constant dense<0.000000e+00> : vector<4xf32>
      %273 = vector.multi_reduction <add>, %272, %cst_102 [1] : vector<4x128xf32> to vector<4xf32>
      %274 = vector.shape_cast %273 : vector<4xf32> to vector<4x1xf32>
      %275 = math.log %274 : vector<4x1xf32>
      %276 = arith.addf %269, %275 : vector<4x1xf32>
      %277 = tpu.iota {dimensions = array<i32: 1>} : vector<4x128xi32>
      %278 = vector.broadcast %267 : vector<4x1xi32> to vector<4x128xi32>
      %279 = arith.cmpi eq, %277, %278 : vector<4x128xi32>
      %cst_103 = arith.constant 0.000000e+00 : f32
      %280 = vector.broadcast %cst_103 : f32 to vector<4x128xf32>
      %281 = arith.select %279, %232, %280 : vector<4x128xi1>, vector<4x128xf32>
      %cst_104 = arith.constant dense<0.000000e+00> : vector<4xf32>
      %282 = vector.multi_reduction <add>, %281, %cst_104 [1] : vector<4x128xf32> to vector<4xf32>
      %283 = vector.shape_cast %282 : vector<4xf32> to vector<4x1xf32>
      %c-100_i32_105 = arith.constant -100 : i32
      %284 = vector.broadcast %c-100_i32_105 : i32 to vector<4x1xi32>
      %285 = arith.cmpi ne, %267, %284 : vector<4x1xi32>
      %286 = arith.subf %276, %283 : vector<4x1xf32>
      %cst_106 = arith.constant 0.000000e+00 : f32
      %287 = vector.broadcast %cst_106 : f32 to vector<4x1xf32>
      %288 = arith.select %285, %286, %287 : vector<4x1xi1>, vector<4x1xf32>
      %289 = arith.extui %285 : vector<4x1xi1> to vector<4x1xi32>
      %290 = arith.sitofp %289 : vector<4x1xi32> to vector<4x1xf32>
      %291 = vector.shape_cast %174 : vector<2x1xf32> to vector<1x2x1xf32>
      %cst_107 = arith.constant dense<0.000000e+00> : vector<1xf32>
      %292 = vector.multi_reduction <add>, %291, %cst_107 [1, 2] : vector<1x2x1xf32> to vector<1xf32>
      %293 = vector.shape_cast %292 : vector<1xf32> to vector<1x1x1xf32>
      %294 = vector.extract %293[0, 0, 0] : f32 from vector<1x1x1xf32>
      %295 = vector.shape_cast %176 : vector<2x1xf32> to vector<1x2x1xf32>
      %cst_108 = arith.constant dense<0.000000e+00> : vector<1xf32>
      %296 = vector.multi_reduction <add>, %295, %cst_108 [1, 2] : vector<1x2x1xf32> to vector<1xf32>
      %297 = vector.shape_cast %296 : vector<1xf32> to vector<1x1x1xf32>
      %298 = vector.extract %297[0, 0, 0] : f32 from vector<1x1x1xf32>
      %299 = vector.shape_cast %260 : vector<4x1xf32> to vector<1x4x1xf32>
      %cst_109 = arith.constant dense<0.000000e+00> : vector<1xf32>
      %300 = vector.multi_reduction <add>, %299, %cst_109 [1, 2] : vector<1x4x1xf32> to vector<1xf32>
      %301 = vector.shape_cast %300 : vector<1xf32> to vector<1x1x1xf32>
      %302 = vector.extract %301[0, 0, 0] : f32 from vector<1x1x1xf32>
      %303 = vector.shape_cast %288 : vector<4x1xf32> to vector<1x4x1xf32>
      %cst_110 = arith.constant dense<0.000000e+00> : vector<1xf32>
      %304 = vector.multi_reduction <add>, %303, %cst_110 [1, 2] : vector<1x4x1xf32> to vector<1xf32>
      %305 = vector.shape_cast %304 : vector<1xf32> to vector<1x1x1xf32>
      %306 = vector.extract %305[0, 0, 0] : f32 from vector<1x1x1xf32>
      %307 = vector.shape_cast %290 : vector<4x1xf32> to vector<1x4x1xf32>
      %cst_111 = arith.constant dense<0.000000e+00> : vector<1xf32>
      %308 = vector.multi_reduction <add>, %307, %cst_111 [1, 2] : vector<1x4x1xf32> to vector<1xf32>
      %309 = vector.shape_cast %308 : vector<1xf32> to vector<1x1x1xf32>
      %310 = vector.extract %309[0, 0, 0] : f32 from vector<1x1x1xf32>
      %311 = tpu.iota {dimensions = array<i32: 1>} : vector<1x128xi32>
      %cst_112 = arith.constant 0.000000e+00 : f32
      %312 = vector.broadcast %cst_112 : f32 to vector<1x128xf32>
      %c0_i32_113 = arith.constant 0 : i32
      %313 = vector.broadcast %c0_i32_113 : i32 to vector<1x128xi32>
      %314 = arith.cmpi eq, %311, %313 : vector<1x128xi32>
      %cst_114 = arith.constant 0.000000e+00 : f32
      %315 = vector.broadcast %294 : f32 to vector<1x128xf32>
      %316 = vector.broadcast %cst_114 : f32 to vector<1x128xf32>
      %317 = arith.select %314, %315, %316 : vector<1x128xi1>, vector<1x128xf32>
      %318 = arith.addf %312, %317 : vector<1x128xf32>
      %c1_i32_115 = arith.constant 1 : i32
      %319 = vector.broadcast %c1_i32_115 : i32 to vector<1x128xi32>
      %320 = arith.cmpi eq, %311, %319 : vector<1x128xi32>
      %cst_116 = arith.constant 0.000000e+00 : f32
      %321 = vector.broadcast %298 : f32 to vector<1x128xf32>
      %322 = vector.broadcast %cst_116 : f32 to vector<1x128xf32>
      %323 = arith.select %320, %321, %322 : vector<1x128xi1>, vector<1x128xf32>
      %324 = arith.addf %318, %323 : vector<1x128xf32>
      %c2_i32_117 = arith.constant 2 : i32
      %325 = vector.broadcast %c2_i32_117 : i32 to vector<1x128xi32>
      %326 = arith.cmpi eq, %311, %325 : vector<1x128xi32>
      %cst_118 = arith.constant 0.000000e+00 : f32
      %327 = vector.broadcast %302 : f32 to vector<1x128xf32>
      %328 = vector.broadcast %cst_118 : f32 to vector<1x128xf32>
      %329 = arith.select %326, %327, %328 : vector<1x128xi1>, vector<1x128xf32>
      %330 = arith.addf %324, %329 : vector<1x128xf32>
      %c3_i32_119 = arith.constant 3 : i32
      %331 = vector.broadcast %c3_i32_119 : i32 to vector<1x128xi32>
      %332 = arith.cmpi eq, %311, %331 : vector<1x128xi32>
      %cst_120 = arith.constant 0.000000e+00 : f32
      %333 = vector.broadcast %266 : f32 to vector<1x128xf32>
      %334 = vector.broadcast %cst_120 : f32 to vector<1x128xf32>
      %335 = arith.select %332, %333, %334 : vector<1x128xi1>, vector<1x128xf32>
      %336 = arith.addf %330, %335 : vector<1x128xf32>
      %c4_i32 = arith.constant 4 : i32
      %337 = vector.broadcast %c4_i32 : i32 to vector<1x128xi32>
      %338 = arith.cmpi eq, %311, %337 : vector<1x128xi32>
      %cst_121 = arith.constant 0.000000e+00 : f32
      %339 = vector.broadcast %306 : f32 to vector<1x128xf32>
      %340 = vector.broadcast %cst_121 : f32 to vector<1x128xf32>
      %341 = arith.select %338, %339, %340 : vector<1x128xi1>, vector<1x128xf32>
      %342 = arith.addf %336, %341 : vector<1x128xf32>
      %c5_i32 = arith.constant 5 : i32
      %343 = vector.broadcast %c5_i32 : i32 to vector<1x128xi32>
      %344 = arith.cmpi eq, %311, %343 : vector<1x128xi32>
      %cst_122 = arith.constant 0.000000e+00 : f32
      %345 = vector.broadcast %310 : f32 to vector<1x128xf32>
      %346 = vector.broadcast %cst_122 : f32 to vector<1x128xf32>
      %347 = arith.select %344, %345, %346 : vector<1x128xi1>, vector<1x128xf32>
      %348 = arith.addf %342, %347 : vector<1x128xf32>
      %c1_123 = arith.constant 1 : index
      %c0_124 = arith.constant 0 : index
      %349 = vector.load %arg14[%c1_123, %c0_124] : memref<8x128xf32, #tpu.memory_space<vmem>>, vector<1x128xf32>
      tpu.vector_store %arg14[%c1_123, %c0_124], %348 {strides = array<i32>} : memref<8x128xf32, #tpu.memory_space<vmem>>, vector<1x128xf32>,
    } else {
    }
    return
  }
  func.func @transform_0(%arg0: i32) -> (i32, i32) {
    %c0_i32 = arith.constant 0 : i32
    %c0_i32_0 = arith.constant 0 : i32
    return %arg0, %c0_i32 : i32, i32
  }
  func.func @transform_1(%arg0: i32) -> (i32, i32) {
    %c0_i32 = arith.constant 0 : i32
    %c0_i32_0 = arith.constant 0 : i32
    return %arg0, %c0_i32 : i32, i32
  }
  func.func @transform_2(%arg0: i32) -> (i32, i32) {
    %c0_i32 = arith.constant 0 : i32
    %c0_i32_0 = arith.constant 0 : i32
    %c0_i32_1 = arith.constant 0 : i32
    return %c0_i32, %c0_i32_0 : i32, i32
  }
  func.func @transform_3(%arg0: i32) -> (i32, i32) {
    %c0_i32 = arith.constant 0 : i32
    %c0_i32_0 = arith.constant 0 : i32
    %c0_i32_1 = arith.constant 0 : i32
    return %c0_i32, %c0_i32_0 : i32, i32
  }
  func.func @transform_4(%arg0: i32) -> (i32, i32) {
    %c0_i32 = arith.constant 0 : i32
    %c0_i32_0 = arith.constant 0 : i32
    %c0_i32_1 = arith.constant 0 : i32
    return %c0_i32, %c0_i32_0 : i32, i32
  }
  func.func @transform_5(%arg0: i32) -> (i32, i32) {
    %c0_i32 = arith.constant 0 : i32
    %c0_i32_0 = arith.constant 0 : i32
    %c0_i32_1 = arith.constant 0 : i32
    return %c0_i32, %c0_i32_0 : i32, i32
  }
  func.func @transform_6(%arg0: i32) -> (i32, i32) {
    %c0_i32 = arith.constant 0 : i32
    %c0_i32_0 = arith.constant 0 : i32
    %c0_i32_1 = arith.constant 0 : i32
    return %c0_i32, %c0_i32_0 : i32, i32
  }
  func.func @transform_7(%arg0: i32) -> (i32, i32) {
    %c0_i32 = arith.constant 0 : i32
    %c0_i32_0 = arith.constant 0 : i32
    %c0_i32_1 = arith.constant 0 : i32
    return %c0_i32, %c0_i32_0 : i32, i32
  }
  func.func @transform_8(%arg0: i32) -> (i32, i32) {
    %c0_i32 = arith.constant 0 : i32
    %c0_i32_0 = arith.constant 0 : i32
    %c0_i32_1 = arith.constant 0 : i32
    return %c0_i32, %c0_i32_0 : i32, i32
  }
  func.func @transform_9(%arg0: i32) -> (i32, i32) {
    %c0_i32 = arith.constant 0 : i32
    %c0_i32_0 = arith.constant 0 : i32
    %c0_i32_1 = arith.constant 0 : i32
    return %c0_i32, %c0_i32_0 : i32, i32
  }
  func.func @transform_10(%arg0: i32) -> (i32, i32) {
    %c0_i32 = arith.constant 0 : i32
    %c0_i32_0 = arith.constant 0 : i32
    %c0_i32_1 = arith.constant 0 : i32
    return %c0_i32, %c0_i32_0 : i32, i32
  }
  func.func @transform_11(%arg0: i32) -> (i32, i32) {
    %c0_i32 = arith.constant 0 : i32
    %c0_i32_0 = arith.constant 0 : i32
    %c0_i32_1 = arith.constant 0 : i32
    return %c0_i32, %c0_i32_0 : i32, i32
  }
  func.func @transform_12(%arg0: i32) -> (i32, i32) {
    %c0_i32 = arith.constant 0 : i32
    %c0_i32_0 = arith.constant 0 : i32
    %c0_i32_1 = arith.constant 0 : i32
    return %c0_i32, %c0_i32_0 : i32, i32
  }
  func.func @transform_13(%arg0: i32) -> (i32, i32) {
    %c0_i32 = arith.constant 0 : i32
    %c0_i32_0 = arith.constant 0 : i32
    return %arg0, %c0_i32 : i32, i32
  }
}

</mosaic_0001>

<bundles_post_ra>
// kernel: pretraining_heads_forward.1
= control target key start
LH: loop header
LB: loop body
LE: loop exit
PB: predicated region body
PF: predicated region fallthrough
CT: control target
= control target key end

     0   :  { %vm56_vm0 = vcmask 261120   ;;  %vm112_vm1 = vcmask 523264   ;;  %s1027_s22 = smov 32   ;;  %s1028_s23 = smov 64   ;;  %vm661_vm11 = vcmask 785408   ;;  %vm674_vm12 = vcmask 1043456   ;;  %s1650_s2 = inlined_call_operand.vmem [shape: f32[32,64], index: 2, kind: input, shape index: {}]   ;;  %s1651_s0 = inlined_call_operand.vmem [shape: bf16[16,32], index: 0, kind: input, shape index: {}]   ;;  %s1652_s10 = inlined_call_operand.vmem [shape: f32[128,128], index: 10, kind: input, shape index: {}]   ;;  %s1653_s3 = inlined_call_operand.vmem [shape: f32[67,64], index: 3, kind: input, shape index: {}]   ;;  %s1654_s8 = inlined_call_operand.vmem [shape: f32[4,128], index: 8, kind: input, shape index: {}]   ;;  %s1655_s11 = inlined_call_operand.vmem [shape: f32[131,128], index: 11, kind: input, shape index: {}]   ;;  %s1656_s4 = inlined_call_operand.vmem [shape: f32[65,256], index: 4, kind: input, shape index: {}]   ;;  %s1657_s7 = inlined_call_operand.vmem [shape: f32[33,128], index: 7, kind: input, shape index: {}]   ;;  %s1658_s12 = inlined_call_operand.vmem [shape: f32[129,256], index: 12, kind: input, shape index: {}]   ;;  %s1659_s1 = inlined_call_operand.vmem [shape: s32[16,2], index: 1, kind: input, shape index: {}]   ;;  %s1660_s5 = inlined_call_operand.vmem [shape: f32[2,32], index: 5, kind: input, shape index: {}]   ;;  %s1661_s9 = inlined_call_operand.vmem [shape: s32[4,2], index: 9, kind: input, shape index: {}]   ;;  %s1662_s6 = inlined_call_operand.vmem [shape: s32[2,1], index: 6, kind: input, shape index: {}]   ;;  %s1663_s13 = inlined_call_operand.vmem [shape: f32[8,128], index: 13, kind: output, shape index: {}]  }
   0x1   :  { %v54_v0 = vld [vmem:[%s1650_s2 + $0x18] sm:$0xff]  ;;  %v53_v1 = vld [vmem:[%s1650_s2 + $0x10] sm:$0xff]  ;;  %v931_v2 = vld [vmem:[%s1651_s0] sm:$0xff]   ;;  %s1026_s0 = smov 96   ;;  %vm789_vm13 = vcmask 1047556   ;;  %vm493_vm14 = vcmask 1041408  }
   0x2   :  { %75 = vmatpush.msra.mxu0 %v54_v0  ;;  %v538_v3 = vld [vmem:[%s1652_s10 + $0x78] sm:$0xff]  ;;  %v52_v4 = vld [vmem:[%s1650_s2 + $0x8] sm:$0xff]  ;;  %v537_v5 = vld [vmem:[%s1652_s10 + $0x70] sm:$0xff]  ;;  %v932_v7 = vunpack.c.l.bf16 %v931_v2  ;;  %v933_v8 = vunpack.c.h.bf16 %v931_v2 }
   0x3   :  { %540 = vmatpush.msra.mxu2 %v538_v3  ;;  %v51_v6 = vld [vmem:[%s1650_s2] sm:$0xff]  ;;  %v536_v9 = vld [vmem:[%s1652_s10 + $0x68] sm:$0xff]  ;;  %v534_v11 = vld [vmem:[%s1652_s10 + $0x58] sm:$0xff] }
   0x4   :  { %76 = vmatpush.msra.mxu0 %v53_v1  ;;  %v535_v10 = vld [vmem:[%s1652_s10 + $0x60] sm:$0xff]  ;;  %v533_v12 = vld [vmem:[%s1652_s10 + $0x50] sm:$0xff]  ;;  %v532_v13 = vld [vmem:[%s1652_s10 + $0x48] sm:$0xff] }
   0x5   :  { %541 = vmatpush.msra.mxu2 %v537_v5  ;;  %v111_v14 = vld [vmem:[%s1653_s3 + $0x38] sm:$0xff]  ;;  %v531_v15 = vld [vmem:[%s1652_s10 + $0x40] sm:$0xff]  ;;  %v110_v16 = vld [vmem:[%s1653_s3 + $0x30] sm:$0xff] }
   0x6   :  { %77 = vmatpush.msra.mxu0 %v52_v4  ;;  %127 = vmatpush.msra.mxu1 %v111_v14  ;;  %v530_v17 = vld [vmem:[%s1652_s10 + $0x38] sm:$0xff]  ;;  %v109_v18 = vld [vmem:[%s1653_s3 + $0x28] sm:$0xff]  ;;  %v529_v19 = vld [vmem:[%s1652_s10 + $0x30] sm:$0xff] }
   0x7   :  { %542 = vmatpush.msra.mxu2 %v536_v9  ;;  %158 = vmatpush.msra.mxu3 %v111_v14  ;;  %v108_v20 = vld [vmem:[%s1653_s3 + $0x20] sm:$0xff]  ;;  %v528_v21 = vld [vmem:[%s1652_s10 + $0x28] sm:$0xff]  ;;  %v107_v22 = vld [vmem:[%s1653_s3 + $0x18] sm:$0xff] }
   0x8   :  { %78 = vmatpush.msra.mxu0 %v51_v6  ;;  %128 = vmatpush.msra.mxu1 %v110_v16  ;;  %v527_v23 = vld [vmem:[%s1652_s10 + $0x20] sm:$0xff]  ;;  %v106_v24 = vld [vmem:[%s1653_s3 + $0x10] sm:$0xff]  ;;  %v526_v25 = vld [vmem:[%s1652_s10 + $0x18] sm:$0xff] }
   0x9   :  { %910 = vmatmul.msk.f32.vlgmr.msra.gmra.mxu0 %vm56_vm0, %v932_v7  ;;  %543 = vmatpush.msra.mxu2 %v535_v10  ;;  %v105_v26 = vld [vmem:[%s1653_s3 + $0x8] sm:$0xff]  ;;  %v525_v27 = vld [vmem:[%s1652_s10 + $0x10] sm:$0xff]  ;;  %v104_v28 = vld [vmem:[%s1653_s3] sm:$0xff] }
   0xa   :  { %159 = vmatpush.msra.mxu3 %v110_v16  ;;  %129 = vmatpush.msra.mxu1 %v109_v18  ;;  %v524_v29 = vld [vmem:[%s1652_s10 + $0x8] sm:$0xff]  ;;  %v523_v30 = vld [vmem:[%s1652_s10] sm:$0xff]  ;;  %v225_v57 = vld [vmem:[%s1656_s4 + $0x70] sm:$0xff] }
   0xb   :  { %544 = vmatpush.msra.mxu2 %v534_v11  ;;  %v519_v31 = vld [vmem:[%s1654_s8] sm:$0xf]  ;;  %v226_v58 = vld [vmem:[%s1656_s4 + $0x78] sm:$0xff]  ;;  %v224_v60 = vld [vmem:[%s1656_s4 + $0x68] sm:$0xff] }
   0xc   :  { %160 = vmatpush.msra.mxu3 %v109_v18  ;;  %130 = vmatpush.msra.mxu1 %v108_v20  ;;  %v979_v32 = vld [vmem:[%s1653_s3 + $0x40] ss:$0 sm:$0xff]  ;;  %v221_v61 = vld [vmem:[%s1656_s4 + $0x50] sm:$0xff]  ;;  %v222_v62 = vld [vmem:[%s1656_s4 + $0x58] sm:$0xff] }
   0xd   :  { %545 = vmatpush.msra.mxu2 %v533_v12  ;;  %271 = vmatpush.msrb.mxu0 %v226_v58  ;;  %v223_v59 = vld [vmem:[%s1656_s4 + $0x60] sm:$0xff]  ;;  %v220_v0 = vld [vmem:[%s1656_s4 + $0x48] sm:$0xff]  ;;  %v217_v1 = vld [vmem:[%s1656_s4 + $0x30] sm:$0xff] }
   0xe   :  { %161 = vmatpush.msra.mxu3 %v108_v20  ;;  %131 = vmatpush.msra.mxu1 %v107_v22  ;;  %v219_v63 = vld [vmem:[%s1656_s4 + $0x40] sm:$0xff]  ;;  %v218_v2 = vld [vmem:[%s1656_s4 + $0x38] sm:$0xff]  ;;  %v216_v4 = vld [vmem:[%s1656_s4 + $0x28] sm:$0xff] }
   0xf   :  { %546 = vmatpush.msra.mxu2 %v532_v13  ;;  %272 = vmatpush.msrb.mxu0 %v224_v60  ;;  %v215_v3 = vld [vmem:[%s1656_s4 + $0x20] sm:$0xff]  ;;  %v213_v5 = vld [vmem:[%s1656_s4 + $0x10] sm:$0xff]  ;;  %v214_v6 = vld [vmem:[%s1656_s4 + $0x18] sm:$0xff] }
  0x10   :  { %162 = vmatpush.msra.mxu3 %v107_v22  ;;  %132 = vmatpush.msra.mxu1 %v106_v24  ;;  %v211_v7 = vld [vmem:[%s1656_s4] sm:$0xff]  ;;  %v584_v9 = vld [vmem:[%s1655_s11 + $0x78] sm:$0xff]  ;;  %v583_v10 = vld [vmem:[%s1655_s11 + $0x70] sm:$0xff] }
  0x11   :  { %911 = vmatmul.msk.f32.gmra.mxu0 %vm56_vm0, %v933_v8  ;;  %547 = vmatpush.msra.mxu2 %v531_v15  ;;  %v212_v8 = vld [vmem:[%s1656_s4 + $0x8] sm:$0xff]  ;;  %v581_v12 = vld [vmem:[%s1655_s11 + $0x60] sm:$0xff]  ;;  %v580_v13 = vld [vmem:[%s1655_s11 + $0x58] sm:$0xff] }
  0x12   :  { %163 = vmatpush.msra.mxu3 %v106_v24  ;;  %133 = vmatpush.msra.mxu1 %v105_v26  ;;  %v582_v11 = vld [vmem:[%s1655_s11 + $0x68] sm:$0xff]  ;;  %v579_v14 = vld [vmem:[%s1655_s11 + $0x50] sm:$0xff]  ;;  %v982_v60 = vld [vmem:[%s1653_s3 + $0x42] ss:$0 sm:$0xff] }
  0x13   :  { %548 = vmatpush.msra.mxu2 %v530_v17  ;;  %273 = vmatpush.msrb.mxu0 %v222_v62  ;;  %v578_v16 = vld [vmem:[%s1655_s11 + $0x48] sm:$0xff]  ;;  %v980_v17 = vld [vmem:[%s1655_s11 + $0x80] ss:$0 sm:$0xff]  ;;  %v575_v22 = vld [vmem:[%s1655_s11 + $0x30] sm:$0xff] }
  0x14   :  { %164 = vmatpush.msra.mxu3 %v105_v26  ;;  %134 = vmatpush.msra.mxu1 %v104_v28  ;;  %v574_v26 = vld [vmem:[%s1655_s11 + $0x28] sm:$0xff] }
  0x15   :  { %549 = vmatpush.msra.mxu2 %v529_v19  ;;  %274 = vmatpush.msrb.mxu0 %v220_v0  ;;  %v577_v19 = vld [vmem:[%s1655_s11 + $0x40] sm:$0xff] }
  0x16   :  { %165 = vmatpush.msra.mxu3 %v104_v28  ;;  %v573_v28 = vld [vmem:[%s1655_s11 + $0x20] sm:$0xff] }
  0x17   :  { %550 = vmatpush.msra.mxu2 %v528_v21  ;;  %275 = vmatpush.msrb.mxu0 %v218_v2  ;;  %v576_v21 = vld [vmem:[%s1655_s11 + $0x38] sm:$0xff] }
  0x18   :  { %248 = vmatpush.msrb.mxu3 %v225_v57 }
  0x19   :  { %551 = vmatpush.msra.mxu2 %v527_v23  ;;  %276 = vmatpush.msrb.mxu0 %v216_v4 }
  0x1a   :  { %249 = vmatpush.msrb.mxu3 %v223_v59 }
  0x1b   :  { %552 = vmatpush.msra.mxu2 %v526_v25  ;;  %277 = vmatpush.msrb.mxu0 %v214_v6 }
  0x1c   :  { %250 = vmatpush.msrb.mxu3 %v221_v61 }
  0x1d   :  { %553 = vmatpush.msra.mxu2 %v525_v27  ;;  %278 = vmatpush.msrb.mxu0 %v212_v8 }
  0x1e   :  { %251 = vmatpush.msrb.mxu3 %v219_v63 }
  0x1f   :  { %554 = vmatpush.msra.mxu2 %v524_v29  ;;  %606 = vmatpush.msra.mxu0 %v584_v9 }
  0x20   :  { %252 = vmatpush.msrb.mxu3 %v217_v1 }
  0x21   :  { %555 = vmatpush.msra.mxu2 %v523_v30  ;;  %607 = vmatpush.msra.mxu0 %v583_v10 }
  0x22   :  { %556 = vmatmul.f32.vlgmr.msra.gmra.mxu2 %v519_v31  ;;  %253 = vmatpush.msrb.mxu3 %v215_v3 }
  0x23   :  { %608 = vmatpush.msra.mxu0 %v582_v11 }
  0x24   :  { %254 = vmatpush.msrb.mxu3 %v213_v5 }
  0x25   :  { %609 = vmatpush.msra.mxu0 %v581_v12 }
  0x26   :  { %255 = vmatpush.msrb.mxu3 %v211_v7 }
  0x27   :  { %610 = vmatpush.msra.mxu0 %v580_v13 }
  0x29   :  { %611 = vmatpush.msra.mxu0 %v579_v14 }
  0x2b   :  { %612 = vmatpush.msra.mxu0 %v578_v16 }
  0x2d   :  { %613 = vmatpush.msra.mxu0 %v577_v19 }
  0x2f   :  { %614 = vmatpush.msra.mxu0 %v576_v21 }
  0x31   :  { %615 = vmatpush.msra.mxu0 %v575_v22 }
  0x33   :  { %616 = vmatpush.msra.mxu0 %v574_v26 }
  0x35   :  { %617 = vmatpush.msra.mxu0 %v573_v28 }
  0x86   :  { %v80_v33 = vpop.f32.mrf.mxu0 }
  0x87   :  { %v81_v34 = vadd.f32 %v979_v32, %v80_v33  ;;  %v572_v33 = vld [vmem:[%s1655_s11 + $0x18] sm:$0xff] }
  0x88   :  { %618 = vmatpush.msra.mxu0 %v572_v33 }
  0x89   :  { %v86_v35 = vmul.f32 %v81_v34, %v81_v34 }
  0x8b   :  { %v88_v36 = vmul.f32 %v86_v35, %v81_v34 }
  0x8d   :  { %v90_v37 = vmul.f32 0.044715, %v88_v36 }
  0x8e   :  { %v83_v38 = vpop.f32.mrf.mxu0 }
  0x8f   :  { %v92_v39 = vadd.f32 %v90_v37, %v81_v34  ;;  %v84_v40 = vadd.f32 %v979_v32, %v83_v38  ;;  %v570_v38 = vld [vmem:[%s1655_s11 + $0x8] sm:$0xff] }
  0x91   :  { %v87_v41 = vmul.f32 %v84_v40, %v84_v40  ;;  %v94_v42 = vmul.f32 0.7978846, %v92_v39 }
  0x93   :  { %v89_v43 = vmul.f32 %v87_v41, %v84_v40  ;;  %986 = vtanh.f32 %v94_v42 }
  0x95   :  { %v91_v44 = vmul.f32 0.044715, %v89_v43 }
  0x97   :  { %v93_v45 = vadd.f32 %v91_v44, %v84_v40 }
  0x99   :  { %v987_v46 = vpop.eup %986  ;;  %v95_v47 = vmul.f32 0.7978846, %v93_v45 }
  0x9a   :  { %v98_v48 = vadd.f32 1.0, %v987_v46 }
  0x9b   :  { %988 = vtanh.f32 %v95_v47 }
  0x9c   :  { %v100_v49 = vmul.f32 0.5, %v98_v48 }
  0x9e   :  { %v1199_v50 = vmul.f32 %v100_v49, %v81_v34  ;;  %v571_v34 = vld [vmem:[%s1655_s11 + $0x10] sm:$0xff] }
  0x9f   :  { %619 = vmatpush.msra.mxu0 %v571_v34 }
  0xa0   :  { %912 = vmatmul.msk.f32.vlgmr.msra.gmra.mxu1 %vm112_vm1, %v1199_v50  ;;  %v142_v51 = vmul.f32 %v1199_v50, %v1199_v50 }
  0xa1   :  { %v989_v52 = vpop.eup %988  ;;  %620 = vmatpush.msra.mxu0 %v570_v38 }
  0xa2   :  { %914 = vmatmul.msk.f32.vlgmr.msra.gmra.mxu3 %vm112_vm1, %v142_v51  ;;  %v99_v53 = vadd.f32 1.0, %v989_v52 }
  0xa3   :  { %585 = vmatpush.msra.mxu3 %v584_v9 }
  0xa4   :  { %v101_v54 = vmul.f32 0.5, %v99_v53 }
  0xa5   :  { %586 = vmatpush.msra.mxu3 %v583_v10  ;;  %v557_v18 = vpop.f32.mrf.mxu2 }
  0xa6   :  { %v1206_v55 = vmul.f32 %v101_v54, %v84_v40  ;;  %v1298_v24 = vadd.f32 %v980_v17, %v557_v18  ;;  %v569_v40 = vld [vmem:[%s1655_s11] sm:$0xff] }
  0xa7   :  { %587 = vmatpush.msra.mxu3 %v582_v11  ;;  %621 = vmatpush.msra.mxu0 %v569_v40 }
  0xa8   :  { %913 = vmatmul.msk.f32.gmra.mxu1 %vm112_vm1, %v1206_v55  ;;  %v143_v56 = vmul.f32 %v1206_v55, %v1206_v55  ;;  %v560_v30 = vmul.f32 %v1298_v24, %v1298_v24 }
  0xa9   :  { %588 = vmatpush.msra.mxu3 %v581_v12 }
  0xaa   :  { %915 = vmatmul.msk.f32.gmra.mxu3 %vm112_vm1, %v143_v56  ;;  %v561_v35 = vmul.f32 %v560_v30, %v1298_v24  ;;  %v981_v56 = vld [vmem:[%s1653_s3 + $0x41] ss:$0 sm:$0xff] }
  0xab   :  { %589 = vmatpush.msra.mxu3 %v580_v13 }
  0xac   :  { %v562_v41 = vmul.f32 0.044715, %v561_v35 }
  0xad   :  { %590 = vmatpush.msra.mxu3 %v579_v14 }
  0xae   :  { %v563_v46 = vadd.f32 %v562_v41, %v1298_v24 }
  0xaf   :  { %591 = vmatpush.msra.mxu3 %v578_v16 }
  0xb0   :  { %v564_v49 = vmul.f32 0.7978846, %v563_v46 }
  0xb1   :  { %592 = vmatpush.msra.mxu3 %v577_v19 }
  0xb3   :  { %593 = vmatpush.msra.mxu3 %v576_v21 }
  0xb5   :  { %594 = vmatpush.msra.mxu3 %v575_v22 }
  0xb7   :  { %595 = vmatpush.msra.mxu3 %v574_v26 }
  0xb9   :  { %596 = vmatpush.msra.mxu3 %v573_v28 }
  0xbb   :  { %597 = vmatpush.msra.mxu3 %v572_v33  ;;  %v983_v33 = vld [vmem:[%s1655_s11 + $0x81] ss:$0 sm:$0xff] }
  0xbd   :  { %598 = vmatpush.msra.mxu3 %v571_v34 }
  0xbf   :  { %599 = vmatpush.msra.mxu3 %v570_v38 }
  0xc1   :  { %600 = vmatpush.msra.mxu3 %v569_v40 }
 0x11d   :  { %v1279_v15 = vpop.f32.mrf.mxu1 }
 0x11e   :  { %v173_v20 = vmul.f32 %v1279_v15, %v1279_v15  ;;  %v179_v54 = vsub.f32 %v1199_v50, %v1279_v15 }
 0x125   :  { %v167_v23 = vpop.f32.mrf.mxu3  ;;  %v139_v29 = vpop.f32.mrf.mxu1 }
 0x126   :  { %v175_v25 = vsub.f32 %v167_v23, %v173_v20  ;;  %v174_v32 = vmul.f32 %v139_v29, %v139_v29  ;;  %v180_v2 = vsub.f32 %v1206_v55, %v139_v29  ;;  %v916_v55 = vld [vmem:[%s1656_s4 + $0x80] ss:$8 sm:$0x3] }
 0x127   :  { %v231_v11 = vperm.slane %v916_v55, 1  ;;  %v230_v14 = vperm.slane %v916_v55, 0  ;;  %v687_v55 = vld [vmem:[%s1658_s12 + $0x58] sm:$0xff] }
 0x128   :  { %v177_v27 = vmax.f32 %v175_v25, 0.0 }
 0x12a   :  { %v181_v31 = vadd.f32 1e-12, %v177_v27 }
 0x12c   :  { %990 = vrsqrt.f32 %v181_v31  ;;  %vm189_vm3 = vweird.f32 %v181_v31 }
 0x12d   :  { %v170_v36 = vpop.f32.mrf.mxu3 }
 0x12e   :  { %v176_v37 = vsub.f32 %v170_v36, %v174_v32  ;;  %v984_v36 = vld [vmem:[%s1655_s11 + $0x82] ss:$0 sm:$0xff] }
 0x130   :  { %v178_v39 = vmax.f32 %v176_v37, 0.0 }
 0x132   :  { %v991_v42 = vpop.eup %990  ;;  %v182_v43 = vadd.f32 1e-12, %v178_v39 }
 0x133   :  { %v184_v44 = vmul.f32 %v991_v42, %v181_v31  ;;  %vm190_vm2 = vweird.f32 %v991_v42 }
 0x134   :  { %992 = vrsqrt.f32 %v182_v43  ;;  %vm191_vm4 = vmor %vm189_vm3, %vm190_vm2  ;;  %vm199_vm6 = vweird.f32 %v182_v43 }
 0x135   :  { %v185_v45 = vmul.f32 %v991_v42, %v184_v44  ;;  %994 = vtanh.f32 %v564_v49 }
 0x137   :  { %v186_v47 = vmul.f32 0.5, %v185_v45 }
 0x139   :  { %v187_v48 = vsub.f32 1.5, %v186_v47  ;;  %v1030_v47 = vmov 0  }
 0x13a   :  { %v993_v51 = vpop.eup %992  ;;  %969 = vset.pattern.permute.xlu1 %v1030_v47  ;;  %967 = vset.pattern.permute.xlu2 %v1030_v47 }
 0x13b   :  { %v188_v52 = vmul.f32 %v991_v42, %v187_v48  ;;  %v194_v53 = vmul.f32 %v993_v51, %v182_v43  ;;  %vm200_vm5 = vweird.f32 %v993_v51  ;;  %v995_v1 = vpop.eup %994  ;;  %v1029_v43 = vmov 1  }
 0x13c   :  { %vm201_vm7 = vmor %vm199_vm6, %vm200_vm5  ;;  %v566_v5 = vadd.f32 1.0, %v995_v1  ;;  %970 = vset.pattern.permute.xlu0 %v1029_v43  ;;  %v700_v1 = vld [vmem:[%s1658_s12 + $0xc0] sm:$0xff] }
 0x13d   :  { %v192_v57 = vsel %vm191_vm4, %v991_v42, %v188_v52  ;;  %v195_v58 = vmul.f32 %v993_v51, %v194_v53  ;;  %v465_v52 = vld [vmem:[%s1657_s7 + $0x10] sm:$0xff]  ;;  %v707_v53 = vld [vmem:[%s1658_s12 + $0xf8] sm:$0xff] }
 0x13e   :  { %v203_v59 = vmul.f32 %v192_v57, %v179_v54  ;;  %v567_v8 = vmul.f32 0.5, %v566_v5  ;;  %v464_v54 = vld [vmem:[%s1657_s7 + $0x8] sm:$0xff]  ;;  %735 = vmatpush.msrb.mxu2 %v707_v53  ;;  %v703_v57 = vld [vmem:[%s1658_s12 + $0xd8] sm:$0xff]  ;;  %v985_v53 = vld [vmem:[%s1657_s7 + $0x20] ss:$0 sm:$0xff] }
 0x13f   :  { %v196_v61 = vmul.f32 0.5, %v195_v58  ;;  %v463_v58 = vld [vmem:[%s1657_s7] sm:$0xff]  ;;  %v691_v5 = vld [vmem:[%s1658_s12 + $0x78] sm:$0xff] }
 0x140   :  { %v206_v62 = vmul.f32 %v981_v56, %v203_v59  ;;  %v568_v9 = vmul.f32 %v567_v8, %v1298_v24  ;;  %v706_v59 = vld [vmem:[%s1658_s12 + $0xf0] sm:$0xff]  ;;  %v689_v8 = vld [vmem:[%s1658_s12 + $0x68] sm:$0xff] }
 0x141   :  { %v197_v63 = vsub.f32 1.5, %v196_v61  ;;  %v704_v61 = vld [vmem:[%s1658_s12 + $0xe0] sm:$0xff] }
 0x142   :  { %v209_v0 = vadd.f32 %v982_v60, %v206_v62  ;;  %v605_v10 = vmul.f32 %v568_v9, %v568_v9  ;;  %v699_v62 = vld [vmem:[%s1658_s12 + $0xb8] sm:$0xff] }
 0x143   :  { %v198_v50 = vmul.f32 %v993_v51, %v197_v63  ;;  %v702_v63 = vld [vmem:[%s1658_s12 + $0xd0] sm:$0xff] }
 0x144   :  { %917 = vmatmul.msk.f32.vlgmr.msrb.gmra.mxu3 %vm112_vm1, %v209_v0  ;;  %919 = vmatmul.msk.f32.vlgmr.msrb.gmra.mxu0 %vm112_vm1, %v209_v0  ;;  %v697_v0 = vld [vmem:[%s1658_s12 + $0xa8] sm:$0xff] }
 0x145   :  { %v202_v3 = vsel %vm201_vm7, %v993_v51, %v198_v50  ;;  %v466_v51 = vld [vmem:[%s1657_s7 + $0x18] sm:$0xff] }
 0x146   :  { %v204_v4 = vmul.f32 %v202_v3, %v180_v2  ;;  %484 = vmatpush.msrb.mxu1 %v466_v51  ;;  %v695_v50 = vld [vmem:[%s1658_s12 + $0x98] sm:$0xff]  ;;  %v698_v2 = vld [vmem:[%s1658_s12 + $0xb0] sm:$0xff]  ;;  %v693_v3 = vld [vmem:[%s1658_s12 + $0x88] sm:$0xff] }
 0x148   :  { %v207_v6 = vmul.f32 %v981_v56, %v204_v4  ;;  %v705_v56 = vld [vmem:[%s1658_s12 + $0xe8] sm:$0xff]  ;;  %485 = vmatpush.msrb.mxu1 %v465_v52  ;;  %v696_v4 = vld [vmem:[%s1658_s12 + $0xa0] sm:$0xff] }
 0x149   :  { %736 = vmatpush.msrb.mxu2 %v705_v56  ;;  %v1520_v52 = vld [vmem:[%s1661_s9] sm:$0xf] }
 0x14a   :  { %v210_v7 = vadd.f32 %v982_v60, %v207_v6  ;;  %486 = vmatpush.msrb.mxu1 %v464_v54  ;;  %v701_v60 = vld [vmem:[%s1658_s12 + $0xc8] sm:$0xff]  ;;  %v1432_v6 = vld [vmem:[%s1659_s1] sm:$0xff]  ;;  %vm813_vm7 = vcmp.ne.s32.totalorder %v1520_v52, 4294967196 }
 0x14b   :  { %737 = vmatpush.msrb.mxu2 %v703_v57  ;;  %vm324_vm5 = vcmp.ne.s32.totalorder %v1432_v6, 4294967196 }
 0x14c   :  { %918 = vmatmul.msk.f32.gmra.mxu3 %vm112_vm1, %v210_v7  ;;  %920 = vmatmul.msk.f32.gmra.mxu0 %vm112_vm1, %v210_v7  ;;  %v694_v7 = vld [vmem:[%s1658_s12 + $0x90] sm:$0xff] }
 0x14d   :  { %487 = vmatpush.msrb.mxu1 %v463_v58  ;;  %738 = vmatpush.msrb.mxu2 %v701_v60 }
 0x14f   :  { %715 = vmatpush.msra.mxu1 %v706_v59  ;;  %739 = vmatpush.msrb.mxu2 %v699_v62  ;;  %v308_v62 = vlaneseq }
 0x151   :  { %716 = vmatpush.msra.mxu1 %v704_v61  ;;  %740 = vmatpush.msrb.mxu2 %v697_v0  ;;  %v1534_v0 = vand.u32 127, %v308_v62 }
 0x153   :  { %717 = vmatpush.msra.mxu1 %v702_v63  ;;  %741 = vmatpush.msrb.mxu2 %v695_v50 }
 0x154   :  { %601 = vmatmul.f32.vlgmr.msra.gmra.mxu3 %v568_v9  ;;  %622 = vmatmul.f32.vlgmr.msra.gmra.mxu0 %v605_v10  ;;  %v1447_v10 = vld [vmem:[%s1659_s1 + $0x8] sm:$0xff] }
 0x155   :  { %718 = vmatpush.msra.mxu1 %v700_v1  ;;  %742 = vmatpush.msrb.mxu2 %v693_v3  ;;  %vm325_vm6 = vcmp.ne.s32.totalorder %v1447_v10, 4294967196 }
 0x157   :  { %719 = vmatpush.msra.mxu1 %v698_v2  ;;  %743 = vmatpush.msrb.mxu2 %v691_v5 }
 0x159   :  { %720 = vmatpush.msra.mxu1 %v696_v4  ;;  %744 = vmatpush.msrb.mxu2 %v689_v8 }
 0x15b   :  { %721 = vmatpush.msra.mxu1 %v694_v7  ;;  %745 = vmatpush.msrb.mxu2 %v687_v55  ;;  %v1542_v7 = vld [vmem:[%s1662_s6] sm:$0x3]  ;;  %s1031_s6 = smov 1  }
 0x1c1   :  { %v280_v12 = vpop.f32.mrf.mxu0 }
 0x1c2   :  { %v1339_v13 = vadd.f32 %v280_v12, %v231_v11  ;;  %v688_v12 = vld [vmem:[%s1658_s12 + $0x60] sm:$0xff] }
 0x1c7   :  { %v257_v15 = vpop.f32.mrf.mxu3 }
 0x1c8   :  { %v1341_v16 = vadd.f32 %v257_v15, %v230_v14  ;;  %v684_v15 = vld [vmem:[%s1658_s12 + $0x40] sm:$0xff] }
 0x1c9   :  { %v283_v17 = vpop.f32.mrf.mxu0 }
 0x1ca   :  { %288 = vmax.xlane.f32.xlu2 %v1341_v16  ;;  %v1369_v49 = vadd.f32 %v283_v17, %v231_v11  ;;  %v690_v11 = vld [vmem:[%s1658_s12 + $0x70] sm:$0xff]  ;;  %v685_v17 = vld [vmem:[%s1658_s12 + $0x48] sm:$0xff] }
 0x1cb   :  { %746 = vmatpush.msrb.mxu2 %v685_v17 }
 0x1cf   :  { %v260_v18 = vpop.f32.mrf.mxu3 }
 0x1d0   :  { %v1344_v19 = vadd.f32 %v260_v18, %v230_v14  ;;  %v686_v14 = vld [vmem:[%s1658_s12 + $0x50] sm:$0xff]  ;;  %v462_v18 = vld [vmem:[%s1660_s5] sm:$0x3] }
 0x1d1   :  { %v623_v22 = vpop.f32.mrf.mxu0  ;;  %923 = vmatmul.msk.f32.vlgmr.msrb.gmra.mxu1 %vm56_vm0, %v462_v18 }
 0x1d7   :  { %v602_v20 = vpop.f32.mrf.mxu3 }
 0x1d8   :  { %v626_v21 = vmul.f32 %v602_v20, %v602_v20  ;;  %v629_v32 = vsub.f32 %v568_v9, %v602_v20  ;;  %v692_v9 = vld [vmem:[%s1658_s12 + $0x80] sm:$0xff]  ;;  %v682_v20 = vld [vmem:[%s1658_s12 + $0x30] sm:$0xff] }
 0x1d9   :  { %722 = vmatpush.msra.mxu1 %v692_v9 }
 0x1da   :  { %v627_v23 = vsub.f32 %v623_v22, %v626_v21  ;;  %v683_v21 = vld [vmem:[%s1658_s12 + $0x38] sm:$0xff]  ;;  %v680_v22 = vld [vmem:[%s1658_s12 + $0x20] sm:$0xff] }
 0x1db   :  { %723 = vmatpush.msra.mxu1 %v690_v11  ;;  %747 = vmatpush.msrb.mxu2 %v683_v21 }
 0x1dc   :  { %v628_v24 = vmax.f32 %v627_v23, 0.0  ;;  %v681_v23 = vld [vmem:[%s1658_s12 + $0x28] sm:$0xff] }
 0x1dd   :  { %724 = vmatpush.msra.mxu1 %v688_v12  ;;  %748 = vmatpush.msrb.mxu2 %v681_v23 }
 0x1de   :  { %v630_v25 = vadd.f32 1e-12, %v628_v24  ;;  %v678_v24 = vld [vmem:[%s1658_s12 + $0x10] sm:$0xff] }
 0x1df   :  { %725 = vmatpush.msra.mxu1 %v686_v14 }
 0x1e0   :  { %996 = vrsqrt.f32 %v630_v25  ;;  %vm637_vm9 = vweird.f32 %v630_v25 }
 0x1e1   :  { %726 = vmatpush.msra.mxu1 %v684_v15 }
 0x1e3   :  { %727 = vmatpush.msra.mxu1 %v682_v20 }
 0x1e5   :  { %728 = vmatpush.msra.mxu1 %v680_v22 }
 0x1e6   :  { %v997_v26 = vpop.eup %996 }
 0x1e7   :  { %v632_v27 = vmul.f32 %v997_v26, %v630_v25  ;;  %vm638_vm8 = vweird.f32 %v997_v26  ;;  %v679_v25 = vld [vmem:[%s1658_s12 + $0x18] sm:$0xff]  ;;  %729 = vmatpush.msra.mxu1 %v678_v24 }
 0x1e8   :  { %vm639_vm10 = vmor %vm637_vm9, %vm638_vm8  ;;  %749 = vmatpush.msrb.mxu2 %v679_v25  ;;  %vm372_vm8 = vcmask 7168   ;;  %vm756_vm9 = vcmp.ge.s32.totalorder %v1520_v52, 0 }
 0x1e9   :  { %v633_v28 = vmul.f32 %v997_v26, %v632_v27  ;;  %v677_v27 = vld [vmem:[%s1658_s12 + $0x8] sm:$0xff] }
 0x1ea   :  { %750 = vmatpush.msrb.mxu2 %v677_v27 }
 0x1eb   :  { %v634_v29 = vmul.f32 0.5, %v633_v28 }
 0x1ed   :  { %v635_v30 = vsub.f32 1.5, %v634_v29 }
 0x1ef   :  { %v636_v31 = vmul.f32 %v997_v26, %v635_v30 }
 0x1f1   :  { %v640_v34 = vsel %vm639_vm10, %v997_v26, %v636_v31  ;;  %v676_v26 = vld [vmem:[%s1658_s12] sm:$0xff]  ;;  %vm778_vm10 = vcmask 3072  }
 0x1f2   :  { %v641_v35 = vmul.f32 %v640_v34, %v629_v32  ;;  %730 = vmatpush.msra.mxu1 %v676_v26 }
 0x1f4   :  { %v643_v37 = vmul.f32 %v983_v33, %v641_v35 }
 0x1f6   :  { %v1352_v38 = vadd.f32 %v984_v36, %v643_v37 }
 0x1f8   :  { %647 = vrot.lane.b32.xlu0 %v1352_v38, %s1026_s0 }
 0x23d   :  { %v1362_v44 = vpop.xlane.xlu2 %288 }
 0x23e   :  { %v292_v45 = vsub.f32 %v1341_v16, %v1362_v44 }
 0x240   :  { %v294_v46 = vmul.f32 1.442695, %v292_v45 }
 0x242   :  { %998 = vpow2.f32 %v294_v46 }
 0x248   :  { %v999_v48 = vpop.eup %998 }
 0x24e   :  { %v489_v54 = vpop.f32.mrf.mxu1 }
 0x24f   :  { %v1527_v56 = vadd.f32 %v985_v53, %v489_v54 }
 0x251   :  { %v494_v57 = vsel %vm493_vm14, %v1527_v56, -inf }
 0x26a   :  { %v648_v39 = vpop.permute.xlu0 %647 }
 0x26b   :  { %v1356_v40 = vsub.f32 %v1352_v38, %v648_v39  ;;  %v651_v41 = vmul.f32 %v648_v39, %v1352_v38 }
 0x26d   :  { %v962_v42 = vpack.i.bf16 %v1356_v40, %v1352_v38  ;;  %666 = vrot.lane.b32.xlu1 %v651_v41, %s1027_s22 }
 0x26f   :  { %963 = vrot.lane.b32.xlu0 %v962_v42, %s1028_s23 }
 0x275   :  { %657 = vrot.lane.b32.xlu1 %v651_v41, %s1026_s0 }
 0x299   :  { %290 = vmax.xlane.f32.xlu0 %v1344_v19 }
 0x29f   :  { %298 = vadd.xlane.f32.xlu1 %v999_v48 }
 0x2a1   :  { %336 = vmax.xlane.f32.xlu0 %v1369_v49 }
 0x2b5   :  { %355 = vperm.xlu0 %970, %v1432_v6  }
 0x2b8   :  { %314 = vperm.xlu1 %969, %v1447_v10  }
 0x2bd   :  { %972 = vset.pattern.permute.xlu0 %v1030_v47 }
 0x2c0   :  { %971 = vset.pattern.permute.xlu1 %v1029_v43 }
 0x2c1   :  { %358 = vperm.xlu1 %971, %v1447_v10  }
 0x2df   :  { %v667_v28 = vpop.permute.xlu1 %666 }
 0x2e1   :  { %v964_v29 = vpop.permute.xlu0 %963 }
 0x2e2   :  { %v965_v30 = vunpack.i.l.bf16 %v964_v29  ;;  %v966_v31 = vunpack.i.h.bf16 %v964_v29 }
 0x2e4   :  { %v669_v32 = vsel %vm112_vm1, %v965_v30, %v1356_v40  ;;  %v660_v36 = vsel %vm112_vm1, %v1352_v38, %v966_v31  ;;  %v1513_v38 = vld [vmem:[%s1658_s12 + $0x100] ss:$8 sm:$0x3]  ;;  %s1032_s12 = smov 127  }
 0x2e5   :  { %v670_v33 = vsel %vm661_vm11, %v669_v32, %v667_v28  ;;  %v712_v46 = vperm.slane %v1513_v38, 1 }
 0x2e6   :  { %v672_v34 = vrot.slane %v670_v33, 4 }
 0x2e7   :  { %v658_v35 = vpop.permute.xlu1 %657 }
 0x2e8   :  { %v662_v37 = vsel %vm661_vm11, %v660_v36, %v658_v35  ;;  %vm514_vm11 = vcmp.ne.s32.totalorder %v1542_v7, 4294967196 }
 0x2e9   :  { %v675_v39 = vsel %vm674_vm12, %v662_v37, %v672_v34 }
 0x2ea   :  { %731 = vmatmul.f32.vlgmr.msra.gmra.mxu1 %v675_v39  ;;  %751 = vmatmul.f32.vlgmr.msrb.gmra.mxu2 %v675_v39 }
 0x30c   :  { %v1504_v41 = vpop.xlane.xlu0 %290 }
 0x30d   :  { %v293_v42 = vsub.f32 %v1344_v19, %v1504_v41 }
 0x30f   :  { %v296_v45 = vmul.f32 1.442695, %v293_v42 }
 0x311   :  { %1000 = vpow2.f32 %v296_v45 }
 0x312   :  { %v299_v20 = vpop.xlane.xlu1 %298 }
 0x314   :  { %v1546_v9 = vpop.xlane.xlu0 %336 }
 0x315   :  { %v339_v12 = vsub.f32 %v1369_v49, %v1546_v9 }
 0x317   :  { %v1001_v40 = vpop.eup %1000  ;;  %v342_v14 = vmul.f32 1.442695, %v339_v12 }
 0x318   :  { %300 = vadd.xlane.f32.xlu2 %v1001_v40 }
 0x327   :  { %v356_v25 = vpop.permute.xlu0 %355 }
 0x328   :  { %vm360_vm0 = vcmp.eq.s32.totalorder %v1534_v0, %v356_v25 }
 0x329   :  { %v362_v26 = vsel %vm360_vm0, %v1339_v13, 0.0  ;;  %vm445_vm0 = vcmp.eq.s32.totalorder %v1534_v0, 2 }
 0x32a   :  { %v315_v23 = vpop.permute.xlu1 %314 }
 0x32b   :  { %vm317_vm4 = vcmp.eq.s32.totalorder %v1534_v0, %v315_v23 }
 0x330   :  { %311 = vperm.xlu2 %967, %v1432_v6  }
 0x333   :  { %v359_v27 = vpop.permute.xlu1 %358 }
 0x334   :  { %vm361_vm1 = vcmp.eq.s32.totalorder %v1534_v0, %v359_v27 }
 0x335   :  { %v363_v28 = vsel %vm361_vm1, %v1369_v49, 0.0  ;;  %vm449_vm1 = vcmp.eq.s32.totalorder %v1534_v0, 3 }
 0x338   :  { %968 = vset.pattern.permute.xlu2 %v1029_v43 }
 0x36d   :  { %v752_v47 = vpop.f32.mrf.mxu2 }
 0x36e   :  { %v753_v48 = vadd.f32 %v752_v47, %v712_v46 }
 0x370   :  { %v790_v51 = vsel %vm789_vm13, %v753_v48, -inf  ;;  %v807_v50 = vrot.slane %v753_v48, 4 }
 0x371   :  { %791 = vmax.xlane.f32.xlu2 %v790_v51 }
 0x389   :  { %803 = vperm.xlu2 %968, %v1520_v52  }
 0x38b   :  { %v1531_v58 = vpop.xlane.xlu2 %300 }
 0x393   :  { %v312_v59 = vpop.permute.xlu2 %311 }
 0x394   :  { %vm316_vm2 = vcmp.eq.s32.totalorder %v1534_v0, %v312_v59 }
 0x395   :  { %v318_v29 = vsel %vm316_vm2, %v1341_v16, 0.0  ;;  %v319_v16 = vsel %vm317_vm4, %v1344_v19, 0.0  ;;  %vm901_vm4 = vcmp.eq.s32.totalorder %v1534_v0, 5 }
 0x3b2   :  { %334 = vmax.xlane.f32.xlu2 %v1339_v13 }
 0x3ba   :  { %495 = vmax.xlane.f32.xlu2 %v494_v57 }
 0x3e4   :  { %v792_v60 = vpop.xlane.xlu2 %791 }
 0x3e5   :  { %v793_v61 = vsub.f32 %v753_v48, %v792_v60 }
 0x3e7   :  { %v794_v63 = vmul.f32 1.442695, %v793_v61 }
 0x3e9   :  { %1002 = vpow2.f32 %v794_v63 }
 0x3ec   :  { %v804_v1 = vpop.permute.xlu2 %803 }
 0x3ed   :  { %vm805_vm15 = vcmp.eq.s32.totalorder %v1534_v0, %v804_v1 }
 0x3ee   :  { %v809_v2 = vsel %vm805_vm15, %v807_v50, 0.0  ;;  %vm441_vm15 = vcmp.eq.s32.totalorder %v1534_v0, 1 }
 0x3ef   :  { %v1003_v3 = vpop.eup %1002  ;;  %v810_v4 = vsel %vm674_vm12, %v809_v2, 0.0  ;;  %vm826_vm12 = vcmask 1024  }
 0x3f0   :  { %811 = vadd.xlane.f32.xlu1 %v810_v4  ;;  %v796_v5 = vsel %vm789_vm13, %v1003_v3, 0.0 }
 0x3f1   :  { %797 = vadd.xlane.f32.xlu0 %v796_v5 }
 0x405   :  { %507 = vperm.xlu0 %972, %v1542_v7  }
 0x40d   :  { %978 = vset.pattern.permute.xlu0 %v1029_v43 }
 0x425   :  { %v335_v8 = vpop.xlane.xlu2 %334 }
 0x426   :  { %v338_v55 = vsub.f32 %v1339_v13, %v335_v8 }
 0x428   :  { %v340_v11 = vmul.f32 1.442695, %v338_v55 }
 0x42a   :  { %1004 = vpow2.f32 %v340_v11 }
 0x42b   :  { %1006 = vpow2.f32 %v342_v14  ;;  %v711_v14 = vperm.slane %v1513_v38, 0 }
 0x42d   :  { %v1551_v15 = vpop.xlane.xlu2 %495 }
 0x42e   :  { %v497_v17 = vsub.f32 %v1527_v56, %v1551_v15 }
 0x430   :  { %v1005_v18 = vpop.eup %1004  ;;  %v498_v21 = vmul.f32 1.442695, %v497_v17  ;;  %v732_v17 = vpop.f32.mrf.mxu1 }
 0x431   :  { %344 = vadd.xlane.f32.xlu2 %v1005_v18  ;;  %v1007_v43 = vpop.eup %1006 }
 0x432   :  { %1008 = vpow2.f32 %v498_v21 }
 0x438   :  { %v1009_v22 = vpop.eup %1008 }
 0x439   :  { %346 = vadd.xlane.f32.xlu2 %v1007_v43  ;;  %v500_v24 = vsel %vm493_vm14, %v1009_v22, 0.0 }
 0x43a   :  { %501 = vadd.xlane.f32.xlu1 %v500_v24 }
 0x441   :  { %364 = vadd.xlane.f32.xlu2 %v362_v26 }
 0x449   :  { %366 = vadd.xlane.f32.xlu2 %v363_v28 }
 0x451   :  { %320 = vadd.xlane.f32.xlu2 %v318_v29 }
 0x463   :  { %v812_v32 = vpop.xlane.xlu1 %811 }
 0x464   :  { %v798_v30 = vpop.xlane.xlu0 %797  ;;  %v815_v34 = vrot.slane %v812_v32, 4 }
 0x465   :  { %1010 = vlog2.f32 %v798_v30 }
 0x46b   :  { %v1011_v31 = vpop.eup %1010 }
 0x46c   :  { %v800_v33 = vmul.f32 0.6931472, %v1011_v31 }
 0x46e   :  { %v801_v35 = vadd.f32 %v800_v33, %v792_v60 }
 0x470   :  { %v817_v13 = vsub.f32 %v801_v35, %v815_v34 }
 0x472   :  { %v819_v36 = vrot.slane %v817_v13, 4 }
 0x474   :  { %820 = vrot.lane.b32.xlu0 %v819_v36, %s1031_s6 }
 0x477   :  { %v508_v37 = vpop.permute.xlu0 %507 }
 0x478   :  { %vm509_vm3 = vcmp.eq.s32.totalorder %v1534_v0, %v508_v37 }
 0x479   :  { %v510_v49 = vsel %vm509_vm3, %v1527_v56, 0.0  ;;  %v1033_v56 = vmov 0.0   ;;  %vm897_vm3 = vcmp.eq.s32.totalorder %v1534_v0, 4 }
 0x47a   :  { %v511_v39 = vsel %vm493_vm14, %v510_v49, 0.0  ;;  %v921_v57 = vsel %vm324_vm5, 1.0, %v1033_v56  ;;  %v922_v59 = vsel %vm325_vm6, 1.0, %v1033_v56  ;;  %v928_v49 = vsel %vm756_vm9, 1.0, %v1033_v56 }
 0x47b   :  { %512 = vadd.xlane.f32.xlu1 %v511_v39  ;;  %v973_v1 = vpack.i.bf16 %v922_v59, %v921_v57  ;;  %v385_v6 = vsel %vm372_vm8, %v921_v57, 0.0  ;;  %v924_v7 = vsel %vm514_vm11, 1.0, %v1033_v56  ;;  %vm437_vm14 = vcmp.eq.s32.totalorder %v1534_v0, 0 }
 0x49e   :  { %322 = vadd.xlane.f32.xlu0 %v319_v16 }
 0x4a4   :  { %v345_v42 = vpop.xlane.xlu2 %344 }
 0x4a5   :  { %1012 = vlog2.f32 %v345_v42  ;;  %v779_v42 = vsel %vm778_vm10, %v928_v49, 0.0 }
 0x4ab   :  { %v1013_v45 = vpop.eup %1012 }
 0x4ac   :  { %v347_v40 = vpop.xlane.xlu2 %346  ;;  %v349_v46 = vmul.f32 0.6931472, %v1013_v45 }
 0x4ad   :  { %1014 = vlog2.f32 %v347_v40  ;;  %v502_v29 = vpop.xlane.xlu1 %501 }
 0x4ae   :  { %v352_v47 = vadd.f32 %v349_v46, %v335_v8  ;;  %1016 = vlog2.f32 %v299_v20  ;;  %v386_v20 = vsel %vm372_vm8, %v922_v59, 0.0  ;;  %v926_v46 = vcvt.s32.f32 %v1520_v52 }
 0x4af   :  { %1018 = vlog2.f32 %v1531_v58  ;;  %v387_v43 = vadd.f32 %v386_v20, %v385_v6 }
 0x4b0   :  { %1020 = vlog2.f32 %v502_v29 }
 0x4b3   :  { %v1015_v48 = vpop.eup %1014 }
 0x4b4   :  { %v365_v51 = vpop.xlane.xlu2 %364  ;;  %v351_v54 = vmul.f32 0.6931472, %v1015_v48  ;;  %v1017_v61 = vpop.eup %1016 }
 0x4b5   :  { %v368_v53 = vsub.f32 %v352_v47, %v365_v51  ;;  %v303_v2 = vmul.f32 0.6931472, %v1017_v61  ;;  %v1019_v18 = vpop.eup %1018 }
 0x4b6   :  { %v353_v60 = vadd.f32 %v351_v54, %v1546_v9  ;;  %v929_v9 = vsel %vm813_vm7, 1.0, %v1033_v56  ;;  %v305_v21 = vmul.f32 0.6931472, %v1019_v18  ;;  %v1021_v10 = vpop.eup %1020 }
 0x4b7   :  { %v370_v19 = vsel %vm324_vm5, %v368_v53, 0.0  ;;  %v306_v4 = vadd.f32 %v303_v2, %v1362_v44  ;;  %v1587_v44 = vadd.f32 %v732_v17, %v711_v14  ;;  %v504_v37 = vmul.f32 0.6931472, %v1021_v10 }
 0x4b8   :  { %399 = vrot.lane.b32.xlu2 %v370_v19, %s1032_s12  ;;  %v307_v23 = vadd.f32 %v305_v21, %v1504_v41  ;;  %v927_v53 = vsel %vm756_vm9, %v926_v46, 0.0  ;;  %v837_v2 = vsel %vm826_vm12, %v924_v7, 0.0 }
 0x4b9   :  { %v762_v22 = vand.u32 2147483647, %v1587_v44  ;;  %v505_v45 = vadd.f32 %v504_v37, %v1551_v15  ;;  %v759_v15 = vmax.f32 %v1587_v44, 0.0  ;;  %v760_v59 = vmul.f32 %v927_v53, %v1587_v44 }
 0x4bb   :  { %v763_v38 = vsub.f32 0.0, %v762_v22 }
 0x4bc   :  { %v367_v63 = vpop.xlane.xlu2 %366 }
 0x4bd   :  { %v369_v50 = vsub.f32 %v353_v60, %v367_v63  ;;  %v764_v31 = vmul.f32 1.442695, %v763_v38 }
 0x4bf   :  { %v371_v3 = vsel %vm325_vm6, %v369_v50, 0.0  ;;  %1022 = vpow2.f32 %v764_v31 }
 0x4c0   :  { %974 = vrot.lane.b32.xlu2 %v973_v1, %s1032_s12  ;;  %401 = vrot.lane.b32.xlu1 %v371_v3, %s1032_s12 }
 0x4c4   :  { %v321_v5 = vpop.xlane.xlu2 %320 }
 0x4c5   :  { %v326_v8 = vsub.f32 %v306_v4, %v321_v5  ;;  %v1023_v36 = vpop.eup %1022  ;;  %v761_v4 = vsub.f32 %v759_v15, %v760_v59 }
 0x4c6   :  { %v767_v39 = vadd.f32 1.0, %v1023_v36  ;;  %v770_v47 = vmul.f32 0.5, %v1023_v36  ;;  %vm766_vm13 = vcmp.gt.f32.partialorder %v1023_v36, 0.0001 }
 0x4c7   :  { %v328_v55 = vsel %vm324_vm5, %v326_v8, 0.0 }
 0x4c8   :  { %872 = vrot.lane.b32.xlu2 %v929_v9, %s1032_s12  ;;  %v373_v27 = vsel %vm372_vm8, %v328_v55, 0.0  ;;  %1024 = vlog2.f32 %v767_v39  ;;  %v771_v19 = vsub.f32 1.0, %v770_v47 }
 0x4ca   :  { %v772_v1 = vmul.f32 %v1023_v36, %v771_v19 }
 0x4ce   :  { %v1025_v51 = vpop.eup %1024 }
 0x4cf   :  { %v769_v57 = vmul.f32 0.6931472, %v1025_v51 }
 0x4d1   :  { %v773_v3 = vsel %vm766_vm13, %v769_v57, %v772_v1 }
 0x4d2   :  { %v774_v5 = vadd.f32 %v773_v3, %v761_v4 }
 0x4d4   :  { %v775_v56 = vsel %vm756_vm9, %v774_v5, 0.0 }
 0x4d5   :  { %v847_v9 = vsel %vm778_vm10, %v775_v56, 0.0 }
 0x4e6   :  { %v821_v11 = vpop.permute.xlu0 %820 }
 0x4e7   :  { %v823_v12 = vsel %vm813_vm7, %v821_v11, 0.0 }
 0x4e8   :  { %858 = vrot.lane.b32.xlu1 %v823_v12, %s1032_s12 }
 0x4ee   :  { %v513_v16 = vpop.xlane.xlu1 %512 }
 0x4ef   :  { %v515_v40 = vsub.f32 %v505_v45, %v513_v16 }
 0x4f1   :  { %v516_v48 = vsel %vm514_vm11, %v515_v40, 0.0 }
 0x4f2   :  { %v827_v54 = vsel %vm826_vm12, %v516_v48, 0.0 }
 0x511   :  { %v323_v24 = vpop.xlane.xlu0 %322 }
 0x512   :  { %v327_v25 = vsub.f32 %v307_v23, %v323_v24  ;;  %v400_v58 = vpop.permute.xlu2 %399  ;;  %388 = vadd.xlane.f32.xlu1 %v387_v43 }
 0x513   :  { %v405_v61 = vsel %vm372_vm8, %v400_v58, 0.0 }
 0x514   :  { %v329_v26 = vsel %vm325_vm6, %v327_v25, 0.0 }
 0x515   :  { %v374_v28 = vsel %vm372_vm8, %v329_v26, 0.0 }
 0x516   :  { %v375_v30 = vadd.f32 %v374_v28, %v373_v27 }
 0x518   :  { %376 = vadd.xlane.f32.xlu0 %v375_v30 }
 0x51a   :  { %v975_v32 = vpop.permute.xlu2 %974 }
 0x51b   :  { %v977_v41 = vunpack.i.h.bf16 %v975_v32  ;;  %v976_v33 = vunpack.i.l.bf16 %v975_v32 }
 0x51d   :  { %v425_v34 = vsel %vm372_vm8, %v976_v33, 0.0  ;;  %v426_v35 = vsel %vm372_vm8, %v977_v41, 0.0 }
 0x51e   :  { %v427_v13 = vadd.f32 %v426_v35, %v425_v34 }
 0x520   :  { %428 = vadd.xlane.f32.xlu0 %v427_v13 }
 0x522   :  { %v873_v8 = vpop.permute.xlu2 %872 }
 0x523   :  { %v875_v55 = vsel %vm778_vm10, %v873_v8, 0.0 }
 0x528   :  { %780 = vadd.xlane.f32.xlu0 %v779_v42 }
 0x530   :  { %828 = vadd.xlane.f32.xlu0 %v827_v54 }
 0x532   :  { %v402_v60 = vpop.permute.xlu1 %401 }
 0x533   :  { %v406_v63 = vsel %vm372_vm8, %v402_v60, 0.0 }
 0x534   :  { %v407_v50 = vadd.f32 %v406_v63, %v405_v61 }
 0x536   :  { %408 = vadd.xlane.f32.xlu2 %v407_v50 }
 0x538   :  { %838 = vadd.xlane.f32.xlu0 %v837_v2 }
 0x53e   :  { %876 = vadd.xlane.f32.xlu2 %v875_v55 }
 0x540   :  { %848 = vadd.xlane.f32.xlu0 %v847_v9 }
 0x55a   :  { %v859_v11 = vpop.permute.xlu1 %858 }
 0x55b   :  { %v861_v12 = vsel %vm778_vm10, %v859_v11, 0.0 }
 0x55c   :  { %862 = vadd.xlane.f32.xlu1 %v861_v12 }
 0x585   :  { %v389_v14 = vpop.xlane.xlu1 %388 }
 0x586   :  { %v390_v17 = vrot.slane %v389_v14, 4 }
 0x588   :  { %v391_v18 = vadd.f32 %v390_v17, %v389_v14 }
 0x58a   :  { %v392_v44 = vrot.slane %v391_v18, 2 }
 0x58b   :  { %v377_v6 = vpop.xlane.xlu0 %376 }
 0x58c   :  { %v378_v20 = vrot.slane %v377_v6, 4  ;;  %v393_v21 = vadd.f32 %v392_v44, %v391_v18 }
 0x58e   :  { %v379_v43 = vadd.f32 %v378_v20, %v377_v6  ;;  %v394_v23 = vrot.slane %v393_v21, 1 }
 0x590   :  { %v380_v22 = vrot.slane %v379_v43, 2  ;;  %v395_v58 = vadd.f32 %v394_v23, %v393_v21 }
 0x592   :  { %v381_v52 = vadd.f32 %v380_v22, %v379_v43 }
 0x593   :  { %v429_v24 = vpop.xlane.xlu0 %428 }
 0x594   :  { %v382_v25 = vrot.slane %v381_v52, 1  ;;  %v430_v28 = vrot.slane %v429_v24, 4 }
 0x596   :  { %v383_v38 = vadd.f32 %v382_v25, %v381_v52  ;;  %v431_v32 = vadd.f32 %v430_v28, %v429_v24  ;;  %v454_v25 = vshrl.u32 %v308_v62, 7 }
 0x598   :  { %934 = vpush %v383_v38  ;;  %v432_v34 = vrot.slane %v431_v32, 2  ;;  %vm455_vm2 = vcmp.eq.s32.totalorder %v454_v25, 0 }
 0x599   :  { %936 = vpush %v395_v58 }
 0x59a   :  { %v433_v16 = vadd.f32 %v432_v34, %v431_v32 }
 0x59b   :  { %v781_v26 = vpop.xlane.xlu0 %780 }
 0x59c   :  { %v782_v27 = vrot.slane %v781_v26, 4  ;;  %v434_v51 = vrot.slane %v433_v16, 1 }
 0x59e   :  { %v783_v30 = vadd.f32 %v782_v27, %v781_v26  ;;  %v435_v61 = vadd.f32 %v434_v51, %v433_v16 }
 0x5a0   :  { %v784_v33 = vrot.slane %v783_v30, 2 }
 0x5a2   :  { %v785_v39 = vadd.f32 %v784_v33, %v783_v30 }
 0x5a3   :  { %v829_v29 = vpop.xlane.xlu0 %828 }
 0x5a4   :  { %v830_v31 = vrot.slane %v829_v29, 4  ;;  %v786_v48 = vrot.slane %v785_v39, 1 }
 0x5a6   :  { %v831_v41 = vadd.f32 %v830_v31, %v829_v29  ;;  %v787_v60 = vadd.f32 %v786_v48, %v785_v39 }
 0x5a8   :  { %v832_v10 = vrot.slane %v831_v41, 2 }
 0x5a9   :  { %v409_v35 = vpop.xlane.xlu2 %408 }
 0x5aa   :  { %v410_v13 = vrot.slane %v409_v35, 4  ;;  %v833_v40 = vadd.f32 %v832_v10, %v831_v41 }
 0x5ab   :  { %v839_v36 = vpop.xlane.xlu0 %838 }
 0x5ac   :  { %v411_v37 = vadd.f32 %v410_v13, %v409_v35  ;;  %v840_v49 = vrot.slane %v839_v36, 4  ;;  %v834_v57 = vrot.slane %v833_v40, 1 }
 0x5ae   :  { %v412_v42 = vrot.slane %v411_v37, 2  ;;  %v841_v45 = vadd.f32 %v840_v49, %v839_v36  ;;  %v835_v50 = vadd.f32 %v834_v57, %v833_v40 }
 0x5b0   :  { %v842_v46 = vrot.slane %v841_v45, 2  ;;  %v413_v47 = vadd.f32 %v412_v42, %v411_v37 }
 0x5b1   :  { %v877_v8 = vpop.xlane.xlu2 %876 }
 0x5b2   :  { %v414_v53 = vrot.slane %v413_v47, 1  ;;  %v843_v54 = vadd.f32 %v842_v46, %v841_v45  ;;  %v878_v55 = vrot.slane %v877_v8, 4 }
 0x5b3   :  { %v849_v19 = vpop.xlane.xlu0 %848 }
 0x5b4   :  { %v850_v15 = vrot.slane %v849_v19, 4  ;;  %v415_v59 = vadd.f32 %v414_v53, %v413_v47  ;;  %v844_v7 = vrot.slane %v843_v54, 1  ;;  %v879_v56 = vadd.f32 %v878_v55, %v877_v8 }
 0x5b6   :  { %v851_v63 = vadd.f32 %v850_v15, %v849_v19  ;;  %938 = vpush %v415_v59  ;;  %v845_v1 = vadd.f32 %v844_v7, %v843_v54  ;;  %v880_v9 = vrot.slane %v879_v56, 2 }
 0x5b7   :  { %940 = vpush %v435_v61 }
 0x5b8   :  { %v852_v2 = vrot.slane %v851_v63, 2  ;;  %942 = vpush %v787_v60  ;;  %v881_v17 = vadd.f32 %v880_v9, %v879_v56 }
 0x5b9   :  { %944 = vpush %v835_v50 }
 0x5ba   :  { %v853_v3 = vadd.f32 %v852_v2, %v851_v63  ;;  %946 = vpush %v845_v1  ;;  %v882_v6 = vrot.slane %v881_v17, 1 }
 0x5bc   :  { %v854_v4 = vrot.slane %v853_v3, 1  ;;  %v883_v43 = vadd.f32 %v882_v6, %v881_v17 }
 0x5be   :  { %v855_v5 = vadd.f32 %v854_v4, %v853_v3 }
 0x5c0   :  { %948 = vpush %v855_v5 }
 0x5c9   :  { %s935_s10 = spop %934 }
 0x5ca   :  { %s937_s30 = spop %936  ;;  %v438_v22 = vstv %s935_s10 }
 0x5cb   :  { %v442_v23 = vstv %s937_s30  ;;  %v439_v52 = vsel %vm437_vm14, %v438_v22, 0.0 }
 0x5cc   :  { %v443_v24 = vsel %vm441_vm15, %v442_v23, 0.0 }
 0x5cd   :  { %v444_v58 = vadd.f32 %v443_v24, %v439_v52 }
 0x5cf   :  { %v863_v11 = vpop.xlane.xlu1 %862 }
 0x5d0   :  { %v864_v12 = vrot.slane %v863_v11, 4 }
 0x5d2   :  { %v865_v14 = vadd.f32 %v864_v12, %v863_v11 }
 0x5d4   :  { %v866_v18 = vrot.slane %v865_v14, 2 }
 0x5d6   :  { %v867_v44 = vadd.f32 %v866_v18, %v865_v14 }
 0x5d8   :  { %v868_v20 = vrot.slane %v867_v44, 1 }
 0x5da   :  { %v869_v21 = vadd.f32 %v868_v20, %v867_v44 }
 0x5dc   :  { %950 = vpush %v869_v21 }
 0x5dd   :  { %952 = vpush %v883_v43 }
 0x5e7   :  { %s939_s14 = spop %938 }
 0x5e8   :  { %v446_v38 = vstv %s939_s14  ;;  %s941_s15 = spop %940 }
 0x5e9   :  { %v447_v26 = vsel %vm445_vm0, %v446_v38, 0.0  ;;  %v450_v27 = vstv %s941_s15  ;;  %s943_s3 = spop %942 }
 0x5ea   :  { %v448_v28 = vadd.f32 %v447_v26, %v444_v58  ;;  %v451_v29 = vsel %vm449_vm1, %v450_v27, 0.0  ;;  %s945_s18 = spop %944  ;;  %v894_v10 = vstv %s943_s3 }
 0x5eb   :  { %s947_s4 = spop %946  ;;  %v885_v32 = vstv %s945_s18  ;;  %v895_v37 = vsel %vm449_vm1, %v894_v10, 0.0 }
 0x5ec   :  { %v452_v30 = vadd.f32 %v451_v29, %v448_v28  ;;  %v888_v62 = vstv %s947_s4  ;;  %v886_v34 = vsel %vm437_vm14, %v885_v32, 0.0 }
 0x5ed   :  { %v889_v33 = vsel %vm441_vm15, %v888_v62, 0.0 }
 0x5ee   :  { %v456_v31 = vsel %vm455_vm2, %v452_v30, 0.0  ;;  %v890_v13 = vadd.f32 %v889_v33, %v886_v34 }
 0x5ef   :  { %457 = vst [vmem:[%s1663_s13] sm:$0xff] %v456_v31 }
 0x5f1   :  { %s949_s19 = spop %948 }
 0x5f2   :  { %v891_v41 = vstv %s949_s19 }
 0x5f3   :  { %v892_v35 = vsel %vm445_vm0, %v891_v41, 0.0 }
 0x5f4   :  { %v893_v36 = vadd.f32 %v892_v35, %v890_v13 }
 0x5f6   :  { %v896_v49 = vadd.f32 %v895_v37, %v893_v36 }
 0x60d   :  { %s951_s20 = spop %950 }
 0x60e   :  { %v898_v39 = vstv %s951_s20  ;;  %s953_s21 = spop %952 }
 0x60f   :  { %v899_v16 = vsel %vm897_vm3, %v898_v39, 0.0  ;;  %v902_v42 = vstv %s953_s21 }
 0x610   :  { %v900_v45 = vadd.f32 %v899_v16, %v896_v49  ;;  %v903_v40 = vsel %vm901_vm4, %v902_v42, 0.0 }
 0x612   :  { %v904_v46 = vadd.f32 %v903_v40, %v900_v45 }
 0x614   :  { %905 = vst [vmem:[%s1663_s13 + $0x1] sm:$0x1] %v904_v46 }

</bundles_post_ra>
